<compile_context>
chip_gen: v5e
topology: v5e:2x2
jax: 0.10.0
libtpu: 0.0.40
codegen_flags: <defaults>
</compile_context>

<pallas_src>
import jax
import jax.numpy as jnp
from jax import lax
from jax.experimental import pallas as pl
from jax.experimental.pallas import tpu as pltpu

BN_EPS = 1e-5
_HALO = 128   # left/right halo (lanes) of the conv scratch; must be >= W + 1

_W_ORDER = ("w12", "wt1", "wt2", "w3", "w4")
_B_ORDER = ("b_cv1", "b_bn2", "b_b1", "b_b2", "b_bn1", "b_cv4")


def _silu(v):
    # SiLU(x) = x * sigmoid(x); tanh form is overflow-free and runs on the EUP slot.
    return 0.5 * v * (1.0 + jnp.tanh(0.5 * v))


def _bf16(v):
    return v.astype(jnp.bfloat16)


# ------------------------------- Pallas kernel -------------------------------
def _make_kernel(c_, M, W, P):
    def mm(w_ref, v_bf16):
        # Single-pass bf16 MXU dot, f32 accumulation.
        return jnp.dot(w_ref[...], v_bf16, preferred_element_type=jnp.float32)

    def kernel(x_ref, masks_ref,
               w12_ref, wt1_ref, wt2_ref, w3_ref, w4_ref,
               b_cv1_ref, b_bn2_ref, b_b1_ref, b_b2_ref, b_bn1_ref, b_cv4_ref,
               out_ref, pad_ref, slab_ref, cat_ref):
        # Zero only the halos (2 x (c_, P) stores per step); the interior
        # [P, P+M) is fully rewritten before every read.
        pad_ref[:, 0:P] = jnp.zeros((c_, P), jnp.float32)
        pad_ref[:, P + M:P + M + P] = jnp.zeros((c_, P), jnp.float32)

        mask_l = masks_ref[0]     # (1, M): 1 where w-1 >= 0   (dw = -1 taps)
        mask_r = masks_ref[1]     # (1, M): 1 where w+1 <  W   (dw = +1 taps)

        def conv3x3_bn_silu(v, wt_ref, b_ref):
            # 3x3 conv (stride 1, pad 1) on the per-image (c_, H*W) layout:
            # 9 taps = static lane-shifted slices of the zero-haloed scratch.
            # Row bleed (dh = +/-1) lands in the zeroed halo; only column bleed
            # (dw = +/-1) needs masking.  The 9 slices are packed into one
            # (9*c_, M) slab so the conv is a single K = 9*c_ MXU dot.
            pad_ref[:, P:P + M] = v
            for k in range(9):
                dh = k // 3 - 1
                dw = k % 3 - 1
                start = P + dh * W + dw
                s = pad_ref[:, start:start + M]
                if dw == -1:
                    s = s * mask_l
                elif dw == 1:
                    s = s * mask_r
                slab_ref[k * c_:(k + 1) * c_, :] = s
            return _silu(mm(wt_ref, _bf16(slab_ref[...])) + b_ref[...])

        xb = _bf16(x_ref[...])                                   # (c1, M)

        # Fused cv1 (1x1 + BN + SiLU) and cv2 (plain 1x1, BN_mid scale folded):
        # one (2c_, c1) dot, sliced on sublanes.
        r = mm(w12_ref, xb)                                      # (2c_, M) f32
        a = _silu(r[0:c_, :] + b_cv1_ref[...])                   # cv1 output
        h2 = _silu(r[c_:2 * c_, :] + b_bn2_ref[...])             # SiLU(BN_mid(cv2(x)))

        # m = Bottleneck(c_, c_, shortcut=True, k=(3,3), e=1.0)
        t = conv3x3_bn_silu(a, wt1_ref, b_b1_ref)
        u = conv3x3_bn_silu(t, wt2_ref, b_b2_ref)
        m = a + u

        # y1 = cv3(m) with BN_mid scale folded -> h1 = SiLU(y1 + b_bn1)
        h1 = _silu(mm(w3_ref, _bf16(m)) + b_bn1_ref[...])

        # cat(y1, y2) folded away: h1/h2 written at sublane offsets 0 / c_ of a
        # (2c_, M) scratch, then a single cv4 dot (BN4 scale folded into w4).
        cat_ref[0:c_, :] = h1
        cat_ref[c_:2 * c_, :] = h2
        z = mm(w4_ref, _bf16(cat_ref[...]))
        out_ref[...] = _silu(z + b_cv4_ref[...]).astype(out_ref.dtype)

    return kernel


def _column_masks(H, W):
    """Lane predicates for the column-boundary bleed of the flat 3x3 shifts.
    masks[0] = valid for dw = -1 (w >= 1); masks[1] = valid for dw = +1 (w <= W-2)."""
    w = jnp.arange(W)
    ml = jnp.tile((w >= 1).astype(jnp.float32), H).reshape(1, H * W)
    mr = jnp.tile((w <= W - 2).astype(jnp.float32), H).reshape(1, H * W)
    return jnp.stack([ml, mr], 0)                       # (2, 1, H*W)


def bottleneck_csp_pallas(x, p):
    N, c1, H, W = x.shape
    c_ = p["b_cv1"].shape[0]
    c2 = p["w4"].shape[0]
    M = H * W                                           # per-image lane dim
    P = _HALO
    assert W + 1 <= P, "halo too small for the 3x3 shift range"

    xf = x.reshape(N, c1, M)                            # free view, no HBM transpose
    masks = _column_masks(H, W)
    weights = [p[k] for k in _W_ORDER]                  # bf16, resident
    biases = [p[k] for k in _B_ORDER]                   # f32 (C, 1), resident

    def resident(a):
        nd = a.ndim
        return pl.BlockSpec(a.shape, lambda n, nd=nd: (0,) * nd)

    out = pl.pallas_call(
        _make_kernel(c_, M, W, P),
        out_shape=jax.ShapeDtypeStruct((N, c2, M), x.dtype),
        grid=(N,),                                      # one image per step, pipelined
        in_specs=[pl.BlockSpec((None, c1, M), lambda n: (n, 0, 0)),
                  resident(masks)]
                 + [resident(a) for a in weights]
                 + [resident(a) for a in biases],
        out_specs=pl.BlockSpec((None, c2, M), lambda n: (n, 0, 0)),
        scratch_shapes=[pltpu.VMEM((c_, P + M + P), jnp.float32),   # haloed conv input
                        pltpu.VMEM((9 * c_, M), jnp.float32),       # 9-tap slab
                        pltpu.VMEM((2 * c_, M), jnp.float32)],      # cat(h1, h2)
        compiler_params=pltpu.CompilerParams(
            dimension_semantics=("parallel",),
            vmem_limit_bytes=32 * 1024 * 1024),
    )(xf, masks, *weights, *biases)

    return out.reshape(N, c2, H, W)


# ----------------------- deterministic parameter setup -----------------------
def init_params(key, c1, c2):
    c_ = int(c2 * 0.5)
    ks = jax.random.split(key, 11)

    def bn_params(k, c):
        kg, kb, km, kv = jax.random.split(k, 4)
        gamma = 1.0 + 0.1 * jax.random.normal(kg, (c,), jnp.float32)
        beta = 0.1 * jax.random.normal(kb, (c,), jnp.float32)
        mean = 0.1 * jax.random.normal(km, (c,), jnp.float32)
        var = 0.5 + jnp.abs(jax.random.normal(kv, (c,), jnp.float32))
        return gamma, beta, mean, var

    raw = {
        "w_cv1": 0.3 * jax.random.normal(ks[0], (c_, c1, 1, 1), jnp.float32),
        "bn_cv1": bn_params(ks[1], c_),
        "w_b1": 0.2 * jax.random.normal(ks[2], (c_, c_, 3, 3), jnp.float32),
        "bn_b1": bn_params(ks[3], c_),
        "w_b2": 0.2 * jax.random.normal(ks[4], (c_, c_, 3, 3), jnp.float32),
        "bn_b2": bn_params(ks[5], c_),
        "w_cv3": 0.3 * jax.random.normal(ks[6], (c_, c_, 1, 1), jnp.float32),
        "w_cv2": 0.3 * jax.random.normal(ks[7], (c_, c1, 1, 1), jnp.float32),
        "bn_mid": bn_params(ks[8], 2 * c_),
        "w_cv4": 0.3 * jax.random.normal(ks[9], (c2, 2 * c_, 1, 1), jnp.float32),
        "bn_cv4": bn_params(ks[10], c2),
    }

    def fold(bn):
        gamma, beta, mean, var = bn
        s = gamma / jnp.sqrt(var + BN_EPS)
        return s, beta - mean * s

    s_cv1, b_cv1 = fold(raw["bn_cv1"])
    s_b1, b_b1 = fold(raw["bn_b1"])
    s_b2, b_b2 = fold(raw["bn_b2"])
    s_mid, b_mid = fold(raw["bn_mid"])
    s_cv4, b_cv4 = fold(raw["bn_cv4"])

    def taps_flat(w, s):
        # (co, ci, 3, 3) -> (co, 9*ci), column block k = kh*3 + kw holds the
        # per-tap (co, ci) matrix; BN scale folded into the output channel.
        co, ci = w.shape[0], w.shape[1]
        t = jnp.transpose(w, (2, 3, 0, 1)).reshape(9, co, ci)       # [k, o, i]
        t = s[None, :, None] * t
        return jnp.transpose(t, (1, 0, 2)).reshape(co, 9 * ci)

    w_cv1 = s_cv1[:, None] * raw["w_cv1"][:, :, 0, 0]               # (c_, c1)
    w_cv2 = s_mid[c_:, None] * raw["w_cv2"][:, :, 0, 0]             # BN_mid(y2) scale folded
    w_cv3 = s_mid[:c_, None] * raw["w_cv3"][:, :, 0, 0]             # BN_mid(y1) scale folded
    w_cv4 = s_cv4[:, None] * raw["w_cv4"][:, :, 0, 0]               # (c2, 2c_)

    bf = jnp.bfloat16
    folded = {
        "w12": jnp.concatenate([w_cv1, w_cv2], axis=0).astype(bf),  # fused cv1|cv2
        "wt1": taps_flat(raw["w_b1"], s_b1).astype(bf),
        "wt2": taps_flat(raw["w_b2"], s_b2).astype(bf),
        "w3": w_cv3.astype(bf),
        "w4": w_cv4.astype(bf),
        "b_cv1": b_cv1.reshape(-1, 1),
        "b_bn2": b_mid[c_:].reshape(-1, 1),
        "b_b1": b_b1.reshape(-1, 1),
        "b_b2": b_b2.reshape(-1, 1),
        "b_bn1": b_mid[:c_].reshape(-1, 1),
        "b_cv4": b_cv4.reshape(-1, 1),
    }
    return raw, folded


# --------------------------- pure-JAX reference ------------------------------
def _conv2d(x, w, pad=0):
    return lax.conv_general_dilated(
        x, w, (1, 1), [(pad, pad), (pad, pad)],
        dimension_numbers=("NCHW", "OIHW", "NCHW"),
        precision=lax.Precision.HIGHEST)


def _bn(x, bn):
    gamma, beta, mean, var = bn
    inv = gamma / jnp.sqrt(var + BN_EPS)
    return x * inv[None, :, None, None] + (beta - mean * inv)[None, :, None, None]


def bottleneck_csp_ref(x, raw):
    def silu(v):
        return v * jax.nn.sigmoid(v)
    a = silu(_bn(_conv2d(x, raw["w_cv1"]), raw["bn_cv1"]))          # cv1
    t = silu(_bn(_conv2d(a, raw["w_b1"], pad=1), raw["bn_b1"]))     # Bottleneck.cv1
    u = silu(_bn(_conv2d(t, raw["w_b2"], pad=1), raw["bn_b2"]))     # Bottleneck.cv2
    m = a + u                                                       # shortcut
    y1 = _conv2d(m, raw["w_cv3"])
    y2 = _conv2d(x, raw["w_cv2"])
    cat = jnp.concatenate([y1, y2], axis=1)
    h = silu(_bn(cat, raw["bn_mid"]))
    return silu(_bn(_conv2d(h, raw["w_cv4"]), raw["bn_cv4"]))       # cv4


if __name__ == "__main__":
    key = jax.random.PRNGKey(0)
    kx, kp = jax.random.split(key)

    N, C1, C2, H, W = 2, 16, 16, 16, 16      # c_ = 8, per-image lane dim H*W = 256
    x = jax.random.normal(kx, (N, C1, H, W), jnp.float32)
    raw, folded = init_params(kp, C1, C2)

    out = jax.block_until_ready(bottleneck_csp_pallas(x, folded))
    ref = jax.block_until_ready(bottleneck_csp_ref(x, raw))

    assert out.shape == (N, C2, H, W) and out.dtype == jnp.float32
    max_err = float(jnp.max(jnp.abs(out - ref)))
    # Accuracy budget: single-pass bf16 MXU dots vs fp32 reference through six
    # stacked conv/BN/SiLU stages -> allow ~1e-1 abs/rel (typical err is ~1e-2).
    assert jnp.allclose(out, ref, atol=1e-1, rtol=1e-1), f"max abs err = {max_err}"
    print("KERNEL_OK")
</pallas_src>

<mosaic_0001>
module attributes {stable_mosaic.version = 11 : i64} {
  func.func @kernel(%arg0: i32, %arg1: memref<1x16x256xf32, #tpu.memory_space<vmem>>, %arg2: memref<2x1x256xf32, #tpu.memory_space<vmem>>, %arg3: memref<16x16xbf16, #tpu.memory_space<vmem>>, %arg4: memref<8x72xbf16, #tpu.memory_space<vmem>>, %arg5: memref<8x72xbf16, #tpu.memory_space<vmem>>, %arg6: memref<8x8xbf16, #tpu.memory_space<vmem>>, %arg7: memref<16x16xbf16, #tpu.memory_space<vmem>>, %arg8: memref<8x1xf32, #tpu.memory_space<vmem>>, %arg9: memref<8x1xf32, #tpu.memory_space<vmem>>, %arg10: memref<8x1xf32, #tpu.memory_space<vmem>>, %arg11: memref<8x1xf32, #tpu.memory_space<vmem>>, %arg12: memref<8x1xf32, #tpu.memory_space<vmem>>, %arg13: memref<16x1xf32, #tpu.memory_space<vmem>>, %arg14: memref<1x16x256xf32, #tpu.memory_space<vmem>>, %arg15: memref<8x512xf32, #tpu.memory_space<vmem>>, %arg16: memref<72x256xf32, #tpu.memory_space<vmem>>, %arg17: memref<16x256xf32, #tpu.memory_space<vmem>>) attributes {dimension_semantics = [#tpu.dimension_semantics<parallel>], iteration_bounds = array<i64: 2>, scalar_prefetch = 0 : i64, scratch_operands = 3 : i64, tpu.core_type = #tpu.core_type<tc>, window_params = [{transform_indices = @transform_0, window_bounds = array<i64: 1, 16, 256>}, {pipeline_mode = #tpu.pipeline_mode<synchronous>, transform_indices = @transform_1, window_bounds = array<i64: 2, 1, 256>}, {pipeline_mode = #tpu.pipeline_mode<synchronous>, transform_indices = @transform_2, window_bounds = array<i64: 16, 16>}, {pipeline_mode = #tpu.pipeline_mode<synchronous>, transform_indices = @transform_3, window_bounds = array<i64: 8, 72>}, {pipeline_mode = #tpu.pipeline_mode<synchronous>, transform_indices = @transform_4, window_bounds = array<i64: 8, 72>}, {pipeline_mode = #tpu.pipeline_mode<synchronous>, transform_indices = @transform_5, window_bounds = array<i64: 8, 8>}, {pipeline_mode = #tpu.pipeline_mode<synchronous>, transform_indices = @transform_6, window_bounds = array<i64: 16, 16>}, {pipeline_mode = #tpu.pipeline_mode<synchronous>, transform_indices = @transform_7, window_bounds = array<i64: 8, 1>}, {pipeline_mode = #tpu.pipeline_mode<synchronous>, transform_indices = @transform_8, window_bounds = array<i64: 8, 1>}, {pipeline_mode = #tpu.pipeline_mode<synchronous>, transform_indices = @transform_9, window_bounds = array<i64: 8, 1>}, {pipeline_mode = #tpu.pipeline_mode<synchronous>, transform_indices = @transform_10, window_bounds = array<i64: 8, 1>}, {pipeline_mode = #tpu.pipeline_mode<synchronous>, transform_indices = @transform_11, window_bounds = array<i64: 8, 1>}, {pipeline_mode = #tpu.pipeline_mode<synchronous>, transform_indices = @transform_12, window_bounds = array<i64: 16, 1>}, {transform_indices = @transform_13, window_bounds = array<i64: 1, 16, 256>}]} {
    %cst = arith.constant 0.000000e+00 : f32
    %0 = vector.broadcast %cst : f32 to vector<8x128xf32>
    %c0 = arith.constant 0 : index
    %c0_0 = arith.constant 0 : index
    %1 = vector.load %arg15[%c0, %c0_0] : memref<8x512xf32, #tpu.memory_space<vmem>>, vector<8x128xf32>
    tpu.vector_store %arg15[%c0, %c0_0], %0 {strides = array<i32>} : memref<8x512xf32, #tpu.memory_space<vmem>>, vector<8x128xf32>,
    %cst_1 = arith.constant 0.000000e+00 : f32
    %2 = vector.broadcast %cst_1 : f32 to vector<8x128xf32>
    %c0_2 = arith.constant 0 : index
    %c384 = arith.constant 384 : index
    %3 = vector.load %arg15[%c0_2, %c384] : memref<8x512xf32, #tpu.memory_space<vmem>>, vector<8x128xf32>
    tpu.vector_store %arg15[%c0_2, %c384], %2 {strides = array<i32>} : memref<8x512xf32, #tpu.memory_space<vmem>>, vector<8x128xf32>,
    %c0_3 = arith.constant 0 : index
    %c0_4 = arith.constant 0 : index
    %c0_5 = arith.constant 0 : index
    %4 = vector.load %arg2[%c0_3, %c0_4, %c0_5] : memref<2x1x256xf32, #tpu.memory_space<vmem>>, vector<1x1x256xf32>
    %5 = vector.shape_cast %4 : vector<1x1x256xf32> to vector<1x256xf32>
    %c1 = arith.constant 1 : index
    %c0_6 = arith.constant 0 : index
    %c0_7 = arith.constant 0 : index
    %6 = vector.load %arg2[%c1, %c0_6, %c0_7] : memref<2x1x256xf32, #tpu.memory_space<vmem>>, vector<1x1x256xf32>
    %7 = vector.shape_cast %6 : vector<1x1x256xf32> to vector<1x256xf32>
    %c0_8 = arith.constant 0 : index
    %c0_9 = arith.constant 0 : index
    %c0_10 = arith.constant 0 : index
    %8 = vector.load %arg1[%c0_8, %c0_9, %c0_10] : memref<1x16x256xf32, #tpu.memory_space<vmem>>, vector<1x16x256xf32>
    %9 = vector.shape_cast %8 : vector<1x16x256xf32> to vector<16x256xf32>
    %10 = arith.truncf %9 : vector<16x256xf32> to vector<16x256xbf16>
    %c0_11 = arith.constant 0 : index
    %c0_12 = arith.constant 0 : index
    %11 = vector.load %arg3[%c0_11, %c0_12] : memref<16x16xbf16, #tpu.memory_space<vmem>>, vector<16x16xbf16>
    %cst_13 = arith.constant dense<0.000000e+00> : vector<16x256xf32>
    %12 = tpu.matmul %11, %10, %cst_13 {dimension_numbers = #tpu.dot_dimension_numbers<[1], [0], [0], [1], [0, 0, 1, 1], [], []>} : vector<16x16xbf16>, vector<16x256xbf16>, vector<16x256xf32> -> vector<16x256xf32>
    %13 = vector.extract_strided_slice %12 {offsets = [0, 0], sizes = [8, 256], strides = [1, 1]} : vector<16x256xf32> to vector<8x256xf32>
    %c0_14 = arith.constant 0 : index
    %c0_15 = arith.constant 0 : index
    %14 = vector.load %arg8[%c0_14, %c0_15] : memref<8x1xf32, #tpu.memory_space<vmem>>, vector<8x1xf32>
    %15 = vector.broadcast %14 : vector<8x1xf32> to vector<8x256xf32>
    %16 = arith.addf %13, %15 : vector<8x256xf32>
    %cst_16 = arith.constant 5.000000e-01 : f32
    %17 = vector.broadcast %cst_16 : f32 to vector<8x256xf32>
    %18 = arith.mulf %17, %16 : vector<8x256xf32>
    %cst_17 = arith.constant 5.000000e-01 : f32
    %19 = vector.broadcast %cst_17 : f32 to vector<8x256xf32>
    %20 = arith.mulf %19, %16 : vector<8x256xf32>
    %21 = math.tanh %20 : vector<8x256xf32>
    %cst_18 = arith.constant 1.000000e+00 : f32
    %22 = vector.broadcast %cst_18 : f32 to vector<8x256xf32>
    %23 = arith.addf %22, %21 : vector<8x256xf32>
    %24 = arith.mulf %18, %23 : vector<8x256xf32>
    %25 = vector.extract_strided_slice %12 {offsets = [8, 0], sizes = [8, 256], strides = [1, 1]} : vector<16x256xf32> to vector<8x256xf32>
    %c0_19 = arith.constant 0 : index
    %c0_20 = arith.constant 0 : index
    %26 = vector.load %arg9[%c0_19, %c0_20] : memref<8x1xf32, #tpu.memory_space<vmem>>, vector<8x1xf32>
    %27 = vector.broadcast %26 : vector<8x1xf32> to vector<8x256xf32>
    %28 = arith.addf %25, %27 : vector<8x256xf32>
    %cst_21 = arith.constant 5.000000e-01 : f32
    %29 = vector.broadcast %cst_21 : f32 to vector<8x256xf32>
    %30 = arith.mulf %29, %28 : vector<8x256xf32>
    %cst_22 = arith.constant 5.000000e-01 : f32
    %31 = vector.broadcast %cst_22 : f32 to vector<8x256xf32>
    %32 = arith.mulf %31, %28 : vector<8x256xf32>
    %33 = math.tanh %32 : vector<8x256xf32>
    %cst_23 = arith.constant 1.000000e+00 : f32
    %34 = vector.broadcast %cst_23 : f32 to vector<8x256xf32>
    %35 = arith.addf %34, %33 : vector<8x256xf32>
    %36 = arith.mulf %30, %35 : vector<8x256xf32>
    %c0_24 = arith.constant 0 : index
    %c128 = arith.constant 128 : index
    %37 = vector.load %arg15[%c0_24, %c128] : memref<8x512xf32, #tpu.memory_space<vmem>>, vector<8x256xf32>
    tpu.vector_store %arg15[%c0_24, %c128], %24 {strides = array<i32>} : memref<8x512xf32, #tpu.memory_space<vmem>>, vector<8x256xf32>,
    %c0_25 = arith.constant 0 : index
    %c111 = arith.constant 111 : index
    %38 = vector.load %arg15[%c0_25, %c111] : memref<8x512xf32, #tpu.memory_space<vmem>>, vector<8x256xf32>
    %39 = vector.broadcast %5 : vector<1x256xf32> to vector<8x256xf32>
    %40 = arith.mulf %38, %39 : vector<8x256xf32>
    %c0_26 = arith.constant 0 : index
    %c0_27 = arith.constant 0 : index
    %41 = vector.load %arg16[%c0_26, %c0_27] : memref<72x256xf32, #tpu.memory_space<vmem>>, vector<8x256xf32>
    tpu.vector_store %arg16[%c0_26, %c0_27], %40 {strides = array<i32>} : memref<72x256xf32, #tpu.memory_space<vmem>>, vector<8x256xf32>,
    %c0_28 = arith.constant 0 : index
    %c112 = arith.constant 112 : index
    %42 = vector.load %arg15[%c0_28, %c112] : memref<8x512xf32, #tpu.memory_space<vmem>>, vector<8x256xf32>
    %c8 = arith.constant 8 : index
    %c0_29 = arith.constant 0 : index
    %43 = vector.load %arg16[%c8, %c0_29] : memref<72x256xf32, #tpu.memory_space<vmem>>, vector<8x256xf32>
    tpu.vector_store %arg16[%c8, %c0_29], %42 {strides = array<i32>} : memref<72x256xf32, #tpu.memory_space<vmem>>, vector<8x256xf32>,
    %c0_30 = arith.constant 0 : index
    %c113 = arith.constant 113 : index
    %44 = vector.load %arg15[%c0_30, %c113] : memref<8x512xf32, #tpu.memory_space<vmem>>, vector<8x256xf32>
    %45 = vector.broadcast %7 : vector<1x256xf32> to vector<8x256xf32>
    %46 = arith.mulf %44, %45 : vector<8x256xf32>
    %c16 = arith.constant 16 : index
    %c0_31 = arith.constant 0 : index
    %47 = vector.load %arg16[%c16, %c0_31] : memref<72x256xf32, #tpu.memory_space<vmem>>, vector<8x256xf32>
    tpu.vector_store %arg16[%c16, %c0_31], %46 {strides = array<i32>} : memref<72x256xf32, #tpu.memory_space<vmem>>, vector<8x256xf32>,
    %c0_32 = arith.constant 0 : index
    %c127 = arith.constant 127 : index
    %48 = vector.load %arg15[%c0_32, %c127] : memref<8x512xf32, #tpu.memory_space<vmem>>, vector<8x256xf32>
    %49 = vector.broadcast %5 : vector<1x256xf32> to vector<8x256xf32>
    %50 = arith.mulf %48, %49 : vector<8x256xf32>
    %c24 = arith.constant 24 : index
    %c0_33 = arith.constant 0 : index
    %51 = vector.load %arg16[%c24, %c0_33] : memref<72x256xf32, #tpu.memory_space<vmem>>, vector<8x256xf32>
    tpu.vector_store %arg16[%c24, %c0_33], %50 {strides = array<i32>} : memref<72x256xf32, #tpu.memory_space<vmem>>, vector<8x256xf32>,
    %c0_34 = arith.constant 0 : index
    %c128_35 = arith.constant 128 : index
    %52 = vector.load %arg15[%c0_34, %c128_35] : memref<8x512xf32, #tpu.memory_space<vmem>>, vector<8x256xf32>
    %c32 = arith.constant 32 : index
    %c0_36 = arith.constant 0 : index
    %53 = vector.load %arg16[%c32, %c0_36] : memref<72x256xf32, #tpu.memory_space<vmem>>, vector<8x256xf32>
    tpu.vector_store %arg16[%c32, %c0_36], %52 {strides = array<i32>} : memref<72x256xf32, #tpu.memory_space<vmem>>, vector<8x256xf32>,
    %c0_37 = arith.constant 0 : index
    %c129 = arith.constant 129 : index
    %54 = vector.load %arg15[%c0_37, %c129] : memref<8x512xf32, #tpu.memory_space<vmem>>, vector<8x256xf32>
    %55 = vector.broadcast %7 : vector<1x256xf32> to vector<8x256xf32>
    %56 = arith.mulf %54, %55 : vector<8x256xf32>
    %c40 = arith.constant 40 : index
    %c0_38 = arith.constant 0 : index
    %57 = vector.load %arg16[%c40, %c0_38] : memref<72x256xf32, #tpu.memory_space<vmem>>, vector<8x256xf32>
    tpu.vector_store %arg16[%c40, %c0_38], %56 {strides = array<i32>} : memref<72x256xf32, #tpu.memory_space<vmem>>, vector<8x256xf32>,
    %c0_39 = arith.constant 0 : index
    %c143 = arith.constant 143 : index
    %58 = vector.load %arg15[%c0_39, %c143] : memref<8x512xf32, #tpu.memory_space<vmem>>, vector<8x256xf32>
    %59 = vector.broadcast %5 : vector<1x256xf32> to vector<8x256xf32>
    %60 = arith.mulf %58, %59 : vector<8x256xf32>
    %c48 = arith.constant 48 : index
    %c0_40 = arith.constant 0 : index
    %61 = vector.load %arg16[%c48, %c0_40] : memref<72x256xf32, #tpu.memory_space<vmem>>, vector<8x256xf32>
    tpu.vector_store %arg16[%c48, %c0_40], %60 {strides = array<i32>} : memref<72x256xf32, #tpu.memory_space<vmem>>, vector<8x256xf32>,
    %c0_41 = arith.constant 0 : index
    %c144 = arith.constant 144 : index
    %62 = vector.load %arg15[%c0_41, %c144] : memref<8x512xf32, #tpu.memory_space<vmem>>, vector<8x256xf32>
    %c56 = arith.constant 56 : index
    %c0_42 = arith.constant 0 : index
    %63 = vector.load %arg16[%c56, %c0_42] : memref<72x256xf32, #tpu.memory_space<vmem>>, vector<8x256xf32>
    tpu.vector_store %arg16[%c56, %c0_42], %62 {strides = array<i32>} : memref<72x256xf32, #tpu.memory_space<vmem>>, vector<8x256xf32>,
    %c0_43 = arith.constant 0 : index
    %c145 = arith.constant 145 : index
    %64 = vector.load %arg15[%c0_43, %c145] : memref<8x512xf32, #tpu.memory_space<vmem>>, vector<8x256xf32>
    %65 = vector.broadcast %7 : vector<1x256xf32> to vector<8x256xf32>
    %66 = arith.mulf %64, %65 : vector<8x256xf32>
    %c64 = arith.constant 64 : index
    %c0_44 = arith.constant 0 : index
    %67 = vector.load %arg16[%c64, %c0_44] : memref<72x256xf32, #tpu.memory_space<vmem>>, vector<8x256xf32>
    tpu.vector_store %arg16[%c64, %c0_44], %66 {strides = array<i32>} : memref<72x256xf32, #tpu.memory_space<vmem>>, vector<8x256xf32>,
    %c0_45 = arith.constant 0 : index
    %c0_46 = arith.constant 0 : index
    %68 = vector.load %arg16[%c0_45, %c0_46] : memref<72x256xf32, #tpu.memory_space<vmem>>, vector<72x256xf32>
    %69 = arith.truncf %68 : vector<72x256xf32> to vector<72x256xbf16>
    %c0_47 = arith.constant 0 : index
    %c0_48 = arith.constant 0 : index
    %70 = vector.load %arg4[%c0_47, %c0_48] : memref<8x72xbf16, #tpu.memory_space<vmem>>, vector<8x72xbf16>
    %cst_49 = arith.constant dense<0.000000e+00> : vector<8x256xf32>
    %71 = tpu.matmul %70, %69, %cst_49 {dimension_numbers = #tpu.dot_dimension_numbers<[1], [0], [0], [1], [0, 0, 1, 1], [], []>} : vector<8x72xbf16>, vector<72x256xbf16>, vector<8x256xf32> -> vector<8x256xf32>
    %c0_50 = arith.constant 0 : index
    %c0_51 = arith.constant 0 : index
    %72 = vector.load %arg10[%c0_50, %c0_51] : memref<8x1xf32, #tpu.memory_space<vmem>>, vector<8x1xf32>
    %73 = vector.broadcast %72 : vector<8x1xf32> to vector<8x256xf32>
    %74 = arith.addf %71, %73 : vector<8x256xf32>
    %cst_52 = arith.constant 5.000000e-01 : f32
    %75 = vector.broadcast %cst_52 : f32 to vector<8x256xf32>
    %76 = arith.mulf %75, %74 : vector<8x256xf32>
    %cst_53 = arith.constant 5.000000e-01 : f32
    %77 = vector.broadcast %cst_53 : f32 to vector<8x256xf32>
    %78 = arith.mulf %77, %74 : vector<8x256xf32>
    %79 = math.tanh %78 : vector<8x256xf32>
    %cst_54 = arith.constant 1.000000e+00 : f32
    %80 = vector.broadcast %cst_54 : f32 to vector<8x256xf32>
    %81 = arith.addf %80, %79 : vector<8x256xf32>
    %82 = arith.mulf %76, %81 : vector<8x256xf32>
    %c0_55 = arith.constant 0 : index
    %c128_56 = arith.constant 128 : index
    %83 = vector.load %arg15[%c0_55, %c128_56] : memref<8x512xf32, #tpu.memory_space<vmem>>, vector<8x256xf32>
    tpu.vector_store %arg15[%c0_55, %c128_56], %82 {strides = array<i32>} : memref<8x512xf32, #tpu.memory_space<vmem>>, vector<8x256xf32>,
    %c0_57 = arith.constant 0 : index
    %c111_58 = arith.constant 111 : index
    %84 = vector.load %arg15[%c0_57, %c111_58] : memref<8x512xf32, #tpu.memory_space<vmem>>, vector<8x256xf32>
    %85 = vector.broadcast %5 : vector<1x256xf32> to vector<8x256xf32>
    %86 = arith.mulf %84, %85 : vector<8x256xf32>
    %c0_59 = arith.constant 0 : index
    %c0_60 = arith.constant 0 : index
    %87 = vector.load %arg16[%c0_59, %c0_60] : memref<72x256xf32, #tpu.memory_space<vmem>>, vector<8x256xf32>
    tpu.vector_store %arg16[%c0_59, %c0_60], %86 {strides = array<i32>} : memref<72x256xf32, #tpu.memory_space<vmem>>, vector<8x256xf32>,
    %c0_61 = arith.constant 0 : index
    %c112_62 = arith.constant 112 : index
    %88 = vector.load %arg15[%c0_61, %c112_62] : memref<8x512xf32, #tpu.memory_space<vmem>>, vector<8x256xf32>
    %c8_63 = arith.constant 8 : index
    %c0_64 = arith.constant 0 : index
    %89 = vector.load %arg16[%c8_63, %c0_64] : memref<72x256xf32, #tpu.memory_space<vmem>>, vector<8x256xf32>
    tpu.vector_store %arg16[%c8_63, %c0_64], %88 {strides = array<i32>} : memref<72x256xf32, #tpu.memory_space<vmem>>, vector<8x256xf32>,
    %c0_65 = arith.constant 0 : index
    %c113_66 = arith.constant 113 : index
    %90 = vector.load %arg15[%c0_65, %c113_66] : memref<8x512xf32, #tpu.memory_space<vmem>>, vector<8x256xf32>
    %91 = vector.broadcast %7 : vector<1x256xf32> to vector<8x256xf32>
    %92 = arith.mulf %90, %91 : vector<8x256xf32>
    %c16_67 = arith.constant 16 : index
    %c0_68 = arith.constant 0 : index
    %93 = vector.load %arg16[%c16_67, %c0_68] : memref<72x256xf32, #tpu.memory_space<vmem>>, vector<8x256xf32>
    tpu.vector_store %arg16[%c16_67, %c0_68], %92 {strides = array<i32>} : memref<72x256xf32, #tpu.memory_space<vmem>>, vector<8x256xf32>,
    %c0_69 = arith.constant 0 : index
    %c127_70 = arith.constant 127 : index
    %94 = vector.load %arg15[%c0_69, %c127_70] : memref<8x512xf32, #tpu.memory_space<vmem>>, vector<8x256xf32>
    %95 = vector.broadcast %5 : vector<1x256xf32> to vector<8x256xf32>
    %96 = arith.mulf %94, %95 : vector<8x256xf32>
    %c24_71 = arith.constant 24 : index
    %c0_72 = arith.constant 0 : index
    %97 = vector.load %arg16[%c24_71, %c0_72] : memref<72x256xf32, #tpu.memory_space<vmem>>, vector<8x256xf32>
    tpu.vector_store %arg16[%c24_71, %c0_72], %96 {strides = array<i32>} : memref<72x256xf32, #tpu.memory_space<vmem>>, vector<8x256xf32>,
    %c0_73 = arith.constant 0 : index
    %c128_74 = arith.constant 128 : index
    %98 = vector.load %arg15[%c0_73, %c128_74] : memref<8x512xf32, #tpu.memory_space<vmem>>, vector<8x256xf32>
    %c32_75 = arith.constant 32 : index
    %c0_76 = arith.constant 0 : index
    %99 = vector.load %arg16[%c32_75, %c0_76] : memref<72x256xf32, #tpu.memory_space<vmem>>, vector<8x256xf32>
    tpu.vector_store %arg16[%c32_75, %c0_76], %98 {strides = array<i32>} : memref<72x256xf32, #tpu.memory_space<vmem>>, vector<8x256xf32>,
    %c0_77 = arith.constant 0 : index
    %c129_78 = arith.constant 129 : index
    %100 = vector.load %arg15[%c0_77, %c129_78] : memref<8x512xf32, #tpu.memory_space<vmem>>, vector<8x256xf32>
    %101 = vector.broadcast %7 : vector<1x256xf32> to vector<8x256xf32>
    %102 = arith.mulf %100, %101 : vector<8x256xf32>
    %c40_79 = arith.constant 40 : index
    %c0_80 = arith.constant 0 : index
    %103 = vector.load %arg16[%c40_79, %c0_80] : memref<72x256xf32, #tpu.memory_space<vmem>>, vector<8x256xf32>
    tpu.vector_store %arg16[%c40_79, %c0_80], %102 {strides = array<i32>} : memref<72x256xf32, #tpu.memory_space<vmem>>, vector<8x256xf32>,
    %c0_81 = arith.constant 0 : index
    %c143_82 = arith.constant 143 : index
    %104 = vector.load %arg15[%c0_81, %c143_82] : memref<8x512xf32, #tpu.memory_space<vmem>>, vector<8x256xf32>
    %105 = vector.broadcast %5 : vector<1x256xf32> to vector<8x256xf32>
    %106 = arith.mulf %104, %105 : vector<8x256xf32>
    %c48_83 = arith.constant 48 : index
    %c0_84 = arith.constant 0 : index
    %107 = vector.load %arg16[%c48_83, %c0_84] : memref<72x256xf32, #tpu.memory_space<vmem>>, vector<8x256xf32>
    tpu.vector_store %arg16[%c48_83, %c0_84], %106 {strides = array<i32>} : memref<72x256xf32, #tpu.memory_space<vmem>>, vector<8x256xf32>,
    %c0_85 = arith.constant 0 : index
    %c144_86 = arith.constant 144 : index
    %108 = vector.load %arg15[%c0_85, %c144_86] : memref<8x512xf32, #tpu.memory_space<vmem>>, vector<8x256xf32>
    %c56_87 = arith.constant 56 : index
    %c0_88 = arith.constant 0 : index
    %109 = vector.load %arg16[%c56_87, %c0_88] : memref<72x256xf32, #tpu.memory_space<vmem>>, vector<8x256xf32>
    tpu.vector_store %arg16[%c56_87, %c0_88], %108 {strides = array<i32>} : memref<72x256xf32, #tpu.memory_space<vmem>>, vector<8x256xf32>,
    %c0_89 = arith.constant 0 : index
    %c145_90 = arith.constant 145 : index
    %110 = vector.load %arg15[%c0_89, %c145_90] : memref<8x512xf32, #tpu.memory_space<vmem>>, vector<8x256xf32>
    %111 = vector.broadcast %7 : vector<1x256xf32> to vector<8x256xf32>
    %112 = arith.mulf %110, %111 : vector<8x256xf32>
    %c64_91 = arith.constant 64 : index
    %c0_92 = arith.constant 0 : index
    %113 = vector.load %arg16[%c64_91, %c0_92] : memref<72x256xf32, #tpu.memory_space<vmem>>, vector<8x256xf32>
    tpu.vector_store %arg16[%c64_91, %c0_92], %112 {strides = array<i32>} : memref<72x256xf32, #tpu.memory_space<vmem>>, vector<8x256xf32>,
    %c0_93 = arith.constant 0 : index
    %c0_94 = arith.constant 0 : index
    %114 = vector.load %arg16[%c0_93, %c0_94] : memref<72x256xf32, #tpu.memory_space<vmem>>, vector<72x256xf32>
    %115 = arith.truncf %114 : vector<72x256xf32> to vector<72x256xbf16>
    %c0_95 = arith.constant 0 : index
    %c0_96 = arith.constant 0 : index
    %116 = vector.load %arg5[%c0_95, %c0_96] : memref<8x72xbf16, #tpu.memory_space<vmem>>, vector<8x72xbf16>
    %cst_97 = arith.constant dense<0.000000e+00> : vector<8x256xf32>
    %117 = tpu.matmul %116, %115, %cst_97 {dimension_numbers = #tpu.dot_dimension_numbers<[1], [0], [0], [1], [0, 0, 1, 1], [], []>} : vector<8x72xbf16>, vector<72x256xbf16>, vector<8x256xf32> -> vector<8x256xf32>
    %c0_98 = arith.constant 0 : index
    %c0_99 = arith.constant 0 : index
    %118 = vector.load %arg11[%c0_98, %c0_99] : memref<8x1xf32, #tpu.memory_space<vmem>>, vector<8x1xf32>
    %119 = vector.broadcast %118 : vector<8x1xf32> to vector<8x256xf32>
    %120 = arith.addf %117, %119 : vector<8x256xf32>
    %cst_100 = arith.constant 5.000000e-01 : f32
    %121 = vector.broadcast %cst_100 : f32 to vector<8x256xf32>
    %122 = arith.mulf %121, %120 : vector<8x256xf32>
    %cst_101 = arith.constant 5.000000e-01 : f32
    %123 = vector.broadcast %cst_101 : f32 to vector<8x256xf32>
    %124 = arith.mulf %123, %120 : vector<8x256xf32>
    %125 = math.tanh %124 : vector<8x256xf32>
    %cst_102 = arith.constant 1.000000e+00 : f32
    %126 = vector.broadcast %cst_102 : f32 to vector<8x256xf32>
    %127 = arith.addf %126, %125 : vector<8x256xf32>
    %128 = arith.mulf %122, %127 : vector<8x256xf32>
    %129 = arith.addf %24, %128 : vector<8x256xf32>
    %130 = arith.truncf %129 : vector<8x256xf32> to vector<8x256xbf16>
    %c0_103 = arith.constant 0 : index
    %c0_104 = arith.constant 0 : index
    %131 = vector.load %arg6[%c0_103, %c0_104] : memref<8x8xbf16, #tpu.memory_space<vmem>>, vector<8x8xbf16>
    %cst_105 = arith.constant dense<0.000000e+00> : vector<8x256xf32>
    %132 = tpu.matmul %131, %130, %cst_105 {dimension_numbers = #tpu.dot_dimension_numbers<[1], [0], [0], [1], [0, 0, 1, 1], [], []>} : vector<8x8xbf16>, vector<8x256xbf16>, vector<8x256xf32> -> vector<8x256xf32>
    %c0_106 = arith.constant 0 : index
    %c0_107 = arith.constant 0 : index
    %133 = vector.load %arg12[%c0_106, %c0_107] : memref<8x1xf32, #tpu.memory_space<vmem>>, vector<8x1xf32>
    %134 = vector.broadcast %133 : vector<8x1xf32> to vector<8x256xf32>
    %135 = arith.addf %132, %134 : vector<8x256xf32>
    %cst_108 = arith.constant 5.000000e-01 : f32
    %136 = vector.broadcast %cst_108 : f32 to vector<8x256xf32>
    %137 = arith.mulf %136, %135 : vector<8x256xf32>
    %cst_109 = arith.constant 5.000000e-01 : f32
    %138 = vector.broadcast %cst_109 : f32 to vector<8x256xf32>
    %139 = arith.mulf %138, %135 : vector<8x256xf32>
    %140 = math.tanh %139 : vector<8x256xf32>
    %cst_110 = arith.constant 1.000000e+00 : f32
    %141 = vector.broadcast %cst_110 : f32 to vector<8x256xf32>
    %142 = arith.addf %141, %140 : vector<8x256xf32>
    %143 = arith.mulf %137, %142 : vector<8x256xf32>
    %c0_111 = arith.constant 0 : index
    %c0_112 = arith.constant 0 : index
    %144 = vector.load %arg17[%c0_111, %c0_112] : memref<16x256xf32, #tpu.memory_space<vmem>>, vector<8x256xf32>
    tpu.vector_store %arg17[%c0_111, %c0_112], %143 {strides = array<i32>} : memref<16x256xf32, #tpu.memory_space<vmem>>, vector<8x256xf32>,
    %c8_113 = arith.constant 8 : index
    %c0_114 = arith.constant 0 : index
    %145 = vector.load %arg17[%c8_113, %c0_114] : memref<16x256xf32, #tpu.memory_space<vmem>>, vector<8x256xf32>
    tpu.vector_store %arg17[%c8_113, %c0_114], %36 {strides = array<i32>} : memref<16x256xf32, #tpu.memory_space<vmem>>, vector<8x256xf32>,
    %c0_115 = arith.constant 0 : index
    %c0_116 = arith.constant 0 : index
    %146 = vector.load %arg17[%c0_115, %c0_116] : memref<16x256xf32, #tpu.memory_space<vmem>>, vector<16x256xf32>
    %147 = arith.truncf %146 : vector<16x256xf32> to vector<16x256xbf16>
    %c0_117 = arith.constant 0 : index
    %c0_118 = arith.constant 0 : index
    %148 = vector.load %arg7[%c0_117, %c0_118] : memref<16x16xbf16, #tpu.memory_space<vmem>>, vector<16x16xbf16>
    %cst_119 = arith.constant dense<0.000000e+00> : vector<16x256xf32>
    %149 = tpu.matmul %148, %147, %cst_119 {dimension_numbers = #tpu.dot_dimension_numbers<[1], [0], [0], [1], [0, 0, 1, 1], [], []>} : vector<16x16xbf16>, vector<16x256xbf16>, vector<16x256xf32> -> vector<16x256xf32>
    %c0_120 = arith.constant 0 : index
    %c0_121 = arith.constant 0 : index
    %150 = vector.load %arg13[%c0_120, %c0_121] : memref<16x1xf32, #tpu.memory_space<vmem>>, vector<16x1xf32>
    %151 = vector.broadcast %150 : vector<16x1xf32> to vector<16x256xf32>
    %152 = arith.addf %149, %151 : vector<16x256xf32>
    %cst_122 = arith.constant 5.000000e-01 : f32
    %153 = vector.broadcast %cst_122 : f32 to vector<16x256xf32>
    %154 = arith.mulf %153, %152 : vector<16x256xf32>
    %cst_123 = arith.constant 5.000000e-01 : f32
    %155 = vector.broadcast %cst_123 : f32 to vector<16x256xf32>
    %156 = arith.mulf %155, %152 : vector<16x256xf32>
    %157 = math.tanh %156 : vector<16x256xf32>
    %cst_124 = arith.constant 1.000000e+00 : f32
    %158 = vector.broadcast %cst_124 : f32 to vector<16x256xf32>
    %159 = arith.addf %158, %157 : vector<16x256xf32>
    %160 = arith.mulf %154, %159 : vector<16x256xf32>
    %c0_125 = arith.constant 0 : index
    %c0_126 = arith.constant 0 : index
    %c0_127 = arith.constant 0 : index
    %161 = vector.load %arg14[%c0_125, %c0_126, %c0_127] : memref<1x16x256xf32, #tpu.memory_space<vmem>>, vector<1x16x256xf32>
    %162 = vector.shape_cast %161 : vector<1x16x256xf32> to vector<16x256xf32>
    %163 = vector.shape_cast %160 : vector<16x256xf32> to vector<1x16x256xf32>
    tpu.vector_store %arg14[%c0_125, %c0_126, %c0_127], %163 {strides = array<i32>} : memref<1x16x256xf32, #tpu.memory_space<vmem>>, vector<1x16x256xf32>,
    return
  }
  func.func @transform_0(%arg0: i32) -> (i32, i32, i32) {
    %c0_i32 = arith.constant 0 : i32
    %c0_i32_0 = arith.constant 0 : i32
    %c0_i32_1 = arith.constant 0 : i32
    return %arg0, %c0_i32, %c0_i32_0 : i32, i32, i32
  }
  func.func @transform_1(%arg0: i32) -> (i32, i32, i32) {
    %c0_i32 = arith.constant 0 : i32
    %c0_i32_0 = arith.constant 0 : i32
    %c0_i32_1 = arith.constant 0 : i32
    %c0_i32_2 = arith.constant 0 : i32
    return %c0_i32, %c0_i32_0, %c0_i32_1 : i32, i32, i32
  }
  func.func @transform_2(%arg0: i32) -> (i32, i32) {
    %c0_i32 = arith.constant 0 : i32
    %c0_i32_0 = arith.constant 0 : i32
    %c0_i32_1 = arith.constant 0 : i32
    return %c0_i32, %c0_i32_0 : i32, i32
  }
  func.func @transform_3(%arg0: i32) -> (i32, i32) {
    %c0_i32 = arith.constant 0 : i32
    %c0_i32_0 = arith.constant 0 : i32
    %c0_i32_1 = arith.constant 0 : i32
    return %c0_i32, %c0_i32_0 : i32, i32
  }
  func.func @transform_4(%arg0: i32) -> (i32, i32) {
    %c0_i32 = arith.constant 0 : i32
    %c0_i32_0 = arith.constant 0 : i32
    %c0_i32_1 = arith.constant 0 : i32
    return %c0_i32, %c0_i32_0 : i32, i32
  }
  func.func @transform_5(%arg0: i32) -> (i32, i32) {
    %c0_i32 = arith.constant 0 : i32
    %c0_i32_0 = arith.constant 0 : i32
    %c0_i32_1 = arith.constant 0 : i32
    return %c0_i32, %c0_i32_0 : i32, i32
  }
  func.func @transform_6(%arg0: i32) -> (i32, i32) {
    %c0_i32 = arith.constant 0 : i32
    %c0_i32_0 = arith.constant 0 : i32
    %c0_i32_1 = arith.constant 0 : i32
    return %c0_i32, %c0_i32_0 : i32, i32
  }
  func.func @transform_7(%arg0: i32) -> (i32, i32) {
    %c0_i32 = arith.constant 0 : i32
    %c0_i32_0 = arith.constant 0 : i32
    %c0_i32_1 = arith.constant 0 : i32
    return %c0_i32, %c0_i32_0 : i32, i32
  }
  func.func @transform_8(%arg0: i32) -> (i32, i32) {
    %c0_i32 = arith.constant 0 : i32
    %c0_i32_0 = arith.constant 0 : i32
    %c0_i32_1 = arith.constant 0 : i32
    return %c0_i32, %c0_i32_0 : i32, i32
  }
  func.func @transform_9(%arg0: i32) -> (i32, i32) {
    %c0_i32 = arith.constant 0 : i32
    %c0_i32_0 = arith.constant 0 : i32
    %c0_i32_1 = arith.constant 0 : i32
    return %c0_i32, %c0_i32_0 : i32, i32
  }
  func.func @transform_10(%arg0: i32) -> (i32, i32) {
    %c0_i32 = arith.constant 0 : i32
    %c0_i32_0 = arith.constant 0 : i32
    %c0_i32_1 = arith.constant 0 : i32
    return %c0_i32, %c0_i32_0 : i32, i32
  }
  func.func @transform_11(%arg0: i32) -> (i32, i32) {
    %c0_i32 = arith.constant 0 : i32
    %c0_i32_0 = arith.constant 0 : i32
    %c0_i32_1 = arith.constant 0 : i32
    return %c0_i32, %c0_i32_0 : i32, i32
  }
  func.func @transform_12(%arg0: i32) -> (i32, i32) {
    %c0_i32 = arith.constant 0 : i32
    %c0_i32_0 = arith.constant 0 : i32
    %c0_i32_1 = arith.constant 0 : i32
    return %c0_i32, %c0_i32_0 : i32, i32
  }
  func.func @transform_13(%arg0: i32) -> (i32, i32, i32) {
    %c0_i32 = arith.constant 0 : i32
    %c0_i32_0 = arith.constant 0 : i32
    %c0_i32_1 = arith.constant 0 : i32
    return %arg0, %c0_i32, %c0_i32_0 : i32, i32, i32
  }
}

</mosaic_0001>

<bundles_post_ra>
// kernel: tpu_custom_call.1
= control target key start
LH: loop header
LB: loop body
LE: loop exit
PB: predicated region body
PF: predicated region fallthrough
CT: control target
= control target key end

     0   :  { %s2109_s0 = inlined_call_operand.hbm [shape: f32[2,16,256], index: 0, kind: input, shape index: {}]   ;;  %s2110_s1 = inlined_call_operand.vmem [shape: f32[2,1,256], index: 1, kind: input, shape index: {}]   ;;  %s2111_s2 = inlined_call_operand.vmem [shape: bf16[16,16], index: 2, kind: input, shape index: {}]   ;;  %s2112_s3 = inlined_call_operand.vmem [shape: bf16[8,72], index: 3, kind: input, shape index: {}]   ;;  %s2113_s4 = inlined_call_operand.vmem [shape: bf16[8,72], index: 4, kind: input, shape index: {}]   ;;  %s2114_s5 = inlined_call_operand.vmem [shape: bf16[8,8], index: 5, kind: input, shape index: {}]   ;;  %s2115_s6 = inlined_call_operand.vmem [shape: bf16[16,16], index: 6, kind: input, shape index: {}]   ;;  %s2116_s7 = inlined_call_operand.vmem [shape: f32[8,1], index: 7, kind: input, shape index: {}]   ;;  %s2117_s8 = inlined_call_operand.vmem [shape: f32[8,1], index: 8, kind: input, shape index: {}]   ;;  %s2118_s9 = inlined_call_operand.vmem [shape: f32[8,1], index: 9, kind: input, shape index: {}]   ;;  %s2119_s10 = inlined_call_operand.vmem [shape: f32[8,1], index: 10, kind: input, shape index: {}]   ;;  %s2120_s11 = inlined_call_operand.vmem [shape: f32[8,1], index: 11, kind: input, shape index: {}]   ;;  %s2121_s12 = inlined_call_operand.vmem [shape: f32[16,1], index: 12, kind: input, shape index: {}]   ;;  %s2122_s13 = inlined_call_operand.hbm [shape: f32[2,16,256], index: 13, kind: output, shape index: {}]  }
   0x1   :  { %2131 = sst [smem:[#allocation17_spill]] %s2109_s0 }
   0x2   :  { %2132 = sst [smem:[#allocation18_spill]] %s2122_s13 }
   0x3   :  { %18 = vsyncpa [#allocation6], 0 }
   0x4   :  { %20 = vsyncpa [#allocation6 + $0x1], 0 }
   0x5   :  { %21 = vsyncpa [#allocation7], 0 }
   0x6   :  { %23 = vsyncpa [#allocation7 + $0x1], 0  ;;  %s1711_s25 = smov 0   ;;  %s1713_s26 = smov 0  }
   0x7   :  { %s1715_s27 = smov 0   ;;  %s1717_s28 = smov 0  }
   0x8 LB: > { %2133 = sst [smem:[#allocation11_spill]] %s1614_s25  ;;  %s1732_s29 = sadd.s32 4294967295, %s1626_s28   ;;  %s1626_s28 = sphi %s1717_s28, %s2150_s28   ;;  %s1622_s27 = sphi %s1715_s27, %s2152_s27   ;;  %s1618_s26 = sphi %s1713_s26, %s2154_s26   ;;  %s1614_s25 = sphi %s1711_s25, %s2153_s25  }
   0x9   : > { %2134 = sst [smem:[#allocation12_spill]] %s1622_s27  ;;  %s1323_s30 = sadd.s32 4294967294, %s1626_s28  }
   0xa   : > { %s1736_s14 = sadd.s32 1, %s1626_s28   ;;  %s36_s15 = sadd.s32 1, %s1622_s27 }
   0xb   : > { %2135 = sst [smem:[#allocation13_spill]] %s1736_s14  ;;  %s33_s16 = ssub.s32 %s1626_s28, %s1736_s14 }
   0xc   : > { %p43_p0 = scmp.ne.s32.totalorder %s1622_s27, %s1618_s26  ;;  %p34_p1 = scmp.eq.s32.totalorder %s33_s16, 0 }
   0xd   : > { %p44_p2 = scmp.eq.s32.totalorder %s1626_s28, 0  ;;  %p49_p3 = scmp.ne.s32.totalorder %s1618_s26, %s1614_s25 }
   0xe   : > { %p50_p4 = scmp.eq.s32.totalorder %s1732_s29, 0  ;;  %p325_p7 = scmp.eq.s32.totalorder %s1732_s29, 1 }
   0xf   : > { %s1748_s17 = scalar_select %p34_p1, %s1622_s27, %s36_s15  }
  0x10   : > { %p1750_p5 = por %p44_p2, %p43_p0  ;;  %p1754_p6 = por %p50_p4, %p49_p3 }
  0x11   : > { %2136 = sst [smem:[#allocation14_spill]] %s1748_s17  ;;  %p331_p8 = scmp.eq.s32.totalorder %s1323_s30, 1 }
  0x12   : > { %p1372_p10 = scmp.lt.s32.totalorder %s1626_s28, 2  ;;  %p1761_p11 = por %p325_p7, %p43_p0 }
  0x13   : > { %p1765_p12 = por %p331_p8, %p49_p3  ;;  %s387_s22 = sand.u32 1, %s1622_s27  }
  0x14   : > { %s2139_s20 = scalar_select %p1761_p11, 1, 0 }
  0x15   : > { %s2141_s21 = scalar_select %p1765_p12, 1, 0 }
  0x16   : > { %2140 = sst [smem:[#allocation15_spill]] %s2139_s20  ;;  %s1356_s23 = sshll.u32 %s1626_s28, 5 }
  0x17   : > { %2142 = sst [smem:[#allocation16_spill]] %s2141_s21  ;;  %s1326_s24 = sshll.u32 %s387_s22, 5 }
  0x18   : > { %s2143_s0 = sld [smem:[#allocation17_spill]]  ;;  %s391_s30 = scalar_lea.vmem [#allocation5], %s1326_s24 }
  0x19   : > { %s399_s25 = sshll.u32 %s391_s30, 4  ;;  %p1776_p13 = pnand %p1372_p10, %p1750_p5  ;;  %s400_s25 = int_to_ptr.vmem [resolvable:$true] %s399_s25 }
  0x1a   : > { %p1329_p0 = scmp.ge.s32.totalorder %s1626_s28, 1  ;;  %p407_p1 = scmp.lt.s32.totalorder %s1626_s28, 3 }
  0x1b   : > { %s388_s27 = scalar_lea.sflag [#allocation6], %s387_s22  ;;  %p1534_p3 = pneg %p1776_p13 }
  0x1e   : > { %s396_s17 = scalar_lea.hbm %s2143_s0, %s1356_s23  ;;  %s1537_s18 = scalar_lea.hbm %s2143_s0, 64 }
  0x1f   : > { %s397_s14 = sshll.u32 %s396_s17, 4  ;;  %s398_s14 = int_to_ptr.hbm [resolvable:$true] %s397_s14 }
  0x20   : > { %s1530_s21 = sshra.s32 %s398_s14, 4  ;;  %s1531_s21 = int_to_ptr.hbm [resolvable:$true] %s1530_s21 }
  0x21   : > { %s1532_s20 = scalar_lea.hbm %s1531_s21, 32  ;;  %p1538_p5 = scmp.lt.s32.totalorder %s1531_s21, %s2143_s0 }
  0x22   : > { %p1533_p2 = scmp.ne.s32.totalorder %s1531_s21, %s1532_s20  ;;  %p1539_p8 = scmp.lt.s32.totalorder %s1537_s18, %s1532_s20 }
  0x24   : > { %p1535_p4 = pnand %p1534_p3, %p1533_p2  ;;  %p1540_p10 = por %p1539_p8, %p1538_p5 }
  0x26   : > { %p1536_p7 = pneg %p1535_p4 }
  0x28   : > { %p1541_p9 = pnand %p1540_p10, %p1536_p7 }
  0x2a   : > { %1544 = shalt.err (!%p1541_p9)
}
  0x2b   : > { %s1628_s22 = smov 256   ;;  %s1629_s16 = smov 16  }
  0x2c   : > { %1367 = dma.hbm_to_vmem [thread:$0]  (!%p1776_p13), %s398_s14, 512, %s400_s25, %s388_s27, %s1628_s22, %s1628_s22, %s1629_s16  }
  0x2d   : > { %p408_p2 = pnand %p1329_p0, %p407_p1 }
  0x2e   : > { %s1797_s30 = sand.u32 (!%p408_p2), 1, %s1618_s26  }
  0x2f   : > { %411 = sbr.rel (%p408_p2) target bundleno = 1117 (0x45d), region = 72  ;;  %s1330_s20 = sshll.u32 (!%p408_p2), %s1797_s30, 5 }
  0x30   : > { %s414_s21 = scalar_lea.sflag (!%p408_p2), [#allocation6], %s1797_s30  ;;  %s417_s17 = scalar_lea.vmem (!%p408_p2), [#allocation5], %s1330_s20 }
  0x34   : > { %1605 = dma.done.wait (%p1754_p6), %s414_s21, 512  }
  0x35   : > { %1607 = vsyncadd (%p1754_p6), %s414_s21, 4294966784  ;;  %v1630_v0 = vmov 0   ;;  %v512_v1 = vld [vmem:[%s2116_s7] sm:$0xff]  ;;  %v469_v3 = vld [vmem:[%s417_s17 + $0x10] sm:$0xff]  ;;  %vm480_vm0 = vcmask 130048   ;;  %s1631_s15 = smov 17  }
  0x36   : > { %1419 = vset.pattern.permute.xlu0 %v1630_v0  ;;  %1460 = vset.pattern.permute.xlu2 %v1630_v0  ;;  %v467_v2 = vld [vmem:[%s417_s17] sm:$0xff]  ;;  %v468_v5 = vld [vmem:[%s417_s17 + $0x8] sm:$0xff]  ;;  %v470_v6 = vld [vmem:[%s417_s17 + $0x18] sm:$0xff]  ;;  %s1632_s22 = smov 15   ;;  %s1633_s16 = smov 1   ;;  %v1637_v15 = vmov 0.0  }
  0x37   : > { %1501 = vset.pattern.permute.xlu1 %v1630_v0  ;;  %515 = vperm.xlu0 %1419, %v512_v1   ;;  %v471_v4 = vpack.c.bf16 %v469_v3, %v467_v2  ;;  %v472_v7 = vpack.c.bf16 %v470_v6, %v468_v5  ;;  %v1357_v8 = vld [vmem:[%s2111_s2] sm:$0xff]  ;;  %s1634_s21 = smov 113   ;;  %s1635_s17 = smov 127   ;;  %vm573_vm1 = vcmask 138240   ;;  %vm625_vm2 = vcmask 121856  }
  0x38   : > { %v1332_v9 = vld [vmem:[%s2110_s1 + $0x2] sm:$0x3]  ;;  %v464_v10 = vld [vmem:[%s2110_s1] sm:$0x3]  ;;  %s1636_s13 = smov 111   ;;  %s1638_s25 = smov 112  }
  0x39   : > { %491 = vmatpush.bf16.msra.mxu0 %v471_v4  ;;  %v603_v11 = vperm.slane %v1332_v9, 1  ;;  %v551_v12 = vperm.slane %v464_v10, 1  ;;  %505 = vmatpush.bf16.msra.mxu1 %v472_v7  ;;  %v602_v13 = vperm.slane %v1332_v9, 0  ;;  %v550_v14 = vperm.slane %v464_v10, 0  ;;  %s1639_s27 = smov 16   ;;  %s2145_s14 = sld [smem:[#allocation18_spill]] }
  0x3a   : > { %vm639_vm3 = vcmask 1039360   ;;  %vm656_vm4 = vcmask 7168   ;;  %vm608_vm5 = vcmask 924672   ;;  %vm556_vm6 = vcmask 908288   ;;  %s1235_s24 = scalar_lea.sflag [#allocation7], %s1797_s30 }
  0x3b   : > { %749 = vrot.lane.b32.xlu1 %v603_v11, %s1631_s15  ;;  %701 = vrot.lane.b32.xlu2 %v551_v12, %s1632_s22  ;;  %vm812_vm7 = vcmask 1043456   ;;  %vm737_vm8 = vcmask 916480   ;;  %vm808_vm9 = vcmask 588800   ;;  %vm1110_vm10 = vcmask 64512  }
  0x3c   : > { %1337 = vmatmul.msk.bf16.vlgmr.msra.gmra.mxu0 %vm480_vm0, %v1357_v8  ;;  %1338 = vmatmul.msk.bf16.vlgmr.msra.gmra.mxu1 %vm480_vm0, %v1357_v8 }
  0x3f   : > { %747 = vrot.lane.b32.xlu0 %v602_v13, %s1631_s15 }
  0x43   : > { %699 = vrot.lane.b32.xlu1 %v550_v14, %s1632_s22  ;;  %670 = vrot.lane.b32.xlu2 %v602_v13, %s1633_s16 }
  0x47   : > { %672 = vrot.lane.b32.xlu0 %v603_v11, %s1633_s16 }
  0x4b   : > { %604 = vrot.lane.b32.xlu1 %v602_v13, %s1634_s21  ;;  %606 = vrot.lane.b32.xlu2 %v603_v11, %s1634_s21 }
  0x4f   : > { %635 = vrot.lane.b32.xlu0 %v550_v14, %s1635_s17 }
  0x53   : > { %637 = vrot.lane.b32.xlu1 %v551_v12, %s1635_s17  ;;  %552 = vrot.lane.b32.xlu2 %v550_v14, %s1636_s13 }
  0x57   : > { %554 = vrot.lane.b32.xlu0 %v551_v12, %s1636_s13 }
  0x5f   : > { %735 = vrot.lane.b32.xlu0 %v1637_v15, %s1638_s25 }
  0x95   : > { %v702_v16 = vpop.permute.xlu2 %701 }
  0x96   : > { %v1835_v17 = vmul.f32 0.0, %v702_v16 }
  0x98   : > { %717 = vrot.lane.b32.xlu1 %v1835_v17, %s1634_s21 }
  0x9d   : > { %v1851_v33 = vpop.permute.xlu2 %670 }
  0xa5   : > { %v1886_v51 = vpop.permute.xlu2 %606 }
  0xa9   : > { %v516_v18 = vpop.permute.xlu0 %515 }
  0xad   : > { %v750_v19 = vpop.permute.xlu1 %749  ;;  %v553_v0 = vpop.permute.xlu2 %552 }
  0xae   : > { %v1839_v20 = vmul.f32 0.0, %v750_v19  ;;  %v1926_v5 = vmul.f32 0.0, %v553_v0 }
  0xb0   : > { %765 = vrot.lane.b32.xlu2 %v1839_v20, %s1636_s13 }
  0xb1   : > { %v1843_v21 = vpop.permute.xlu0 %747 }
  0xb2   : > { %v1863_v41 = vsel %vm573_vm1, %v1843_v21, %v750_v19 }
  0xb5   : > { %v1845_v22 = vpop.permute.xlu1 %699 }
  0xb6   : > { %v1867_v42 = vsel %vm625_vm2, %v1845_v22, %v702_v16 }
  0xb9   : > { %v493_v23 = vpop.f32.mrf.mxu0  ;;  %v673_v24 = vpop.permute.xlu0 %672 }
  0xba   : > { %v518_v25 = vadd.f32 %v516_v18, %v493_v23  ;;  %v507_v26 = vpop.f32.mrf.mxu1  ;;  %v1847_v27 = vmul.f32 0.0, %v673_v24  ;;  %v1884_v50 = vsel %vm656_vm4, %v1851_v33, %v673_v24 }
  0xbb   : > { %v519_v28 = vadd.f32 %v516_v18, %v507_v26 }
  0xbc   : > { %v520_v29 = vmul.f32 0.5, %v518_v25  ;;  %688 = vrot.lane.b32.xlu2 %v1847_v27, %s1635_s17 }
  0xbd   : > { %v521_v30 = vmul.f32 0.5, %v519_v28  ;;  %v605_v31 = vpop.permute.xlu1 %604 }
  0xbe   : > { %1502 = vtanh.f32 %v520_v29  ;;  %v1890_v53 = vsel %vm608_vm5, %v605_v31, %v1886_v51  ;;  %v1902_v58 = vmul.f32 0.0, %v605_v31 }
  0xbf   : > { %1504 = vtanh.f32 %v521_v30 }
  0xc1   : > { %v636_v43 = vpop.permute.xlu0 %635 }
  0xc2   : > { %v1892_v54 = vmul.f32 0.0, %v636_v43 }
  0xc4   : > { %v1503_v32 = vpop.eup %1502 }
  0xc5   : > { %v1505_v34 = vpop.eup %1504  ;;  %v524_v35 = vadd.f32 1.0, %v1503_v32  ;;  %v1857_v39 = vpop.permute.xlu1 %637 }
  0xc6   : > { %v525_v36 = vadd.f32 1.0, %v1505_v34  ;;  %v1875_v46 = vsel %vm639_vm3, %v636_v43, %v1857_v39 }
  0xc7   : > { %v1853_v37 = vmul.f32 %v524_v35, %v520_v29 }
  0xc8   : > { %v1855_v38 = vmul.f32 %v525_v36, %v521_v30 }
  0xc9   : > { %v755_v40 = vmul.f32 %v1843_v21, %v1853_v37  ;;  %v707_v47 = vmul.f32 %v1845_v22, %v1853_v37  ;;  %v645_v55 = vmul.f32 %v1875_v46, %v1853_v37  ;;  %v678_v56 = vmul.f32 %v1851_v33, %v1853_v37  ;;  %v1910_v63 = vpop.permute.xlu0 %554 }
  0xca   : > { %v1420_v44 = vpack.i.bf16 %v1855_v38, %v1853_v37  ;;  %v756_v45 = vmul.f32 %v1863_v41, %v1855_v38  ;;  %v708_v48 = vmul.f32 %v1867_v42, %v1855_v38  ;;  %v679_v57 = vmul.f32 %v1884_v50, %v1855_v38 }
  0xcb   : > { %v614_v59 = vmul.f32 %v1890_v53, %v1853_v37  ;;  %v1445_v60 = vpack.i.bf16 %v645_v55, %v1892_v54  ;;  %v563_v1 = vmul.f32 %v1910_v63, %v1855_v38  ;;  %v615_v2 = vmul.f32 %v1886_v51, %v1855_v38 }
  0xcc   : > { %1421 = vrot.lane.b32.xlu2 %v1420_v44, %s1638_s25  ;;  %v1425_v49 = vpack.i.bf16 %v756_v45, %v755_v40  ;;  %v1430_v52 = vpack.i.bf16 %v708_v48, %v707_v47  ;;  %v1435_v61 = vpack.i.bf16 %v679_v57, %v678_v56  ;;  %v646_v3 = vmul.f32 %v1857_v39, %v1855_v38 }
  0xcd   : > { %v1440_v62 = vpack.i.bf16 %v614_v59, %v1902_v58  ;;  %v1922_v4 = vsel %vm556_vm6, %v553_v0, %v1910_v63  ;;  %v1455_v8 = vpack.i.bf16 %v1853_v37, %v1637_v15 }
  0xce   : > { %1426 = vrot.lane.b32.xlu1 %v1425_v49, %s1636_s13  ;;  %1431 = vrot.lane.b32.xlu0 %v1430_v52, %s1634_s21  ;;  %v562_v6 = vmul.f32 %v1922_v4, %v1853_v37 }
  0xd0   : > { %v1450_v7 = vpack.i.bf16 %v562_v6, %v1926_v5 }
  0xd1   : > { %v736_v12 = vpop.permute.xlu0 %735 }
  0xd4   : > { %1446 = vrot.lane.b32.xlu2 %v1445_v60, %s1633_s16 }
  0xd6   : > { %1436 = vrot.lane.b32.xlu1 %v1435_v61, %s1635_s17  ;;  %1441 = vrot.lane.b32.xlu0 %v1440_v62, %s1632_s22 }
  0xdc   : > { %571 = vrot.lane.b32.xlu2 %v563_v1, %s1631_s15 }
  0xde   : > { %623 = vrot.lane.b32.xlu1 %v615_v2, %s1632_s22  ;;  %654 = vrot.lane.b32.xlu0 %v646_v3, %s1633_s16  ;;  %v802_v2 = vld [vmem:[%s2118_s9] sm:$0xff] }
  0xe4   : > { %805 = vperm.xlu2 %1460, %v802_v2  }
  0xe6   : > { %1451 = vrot.lane.b32.xlu1 %v1450_v7, %s1631_s15  ;;  %1456 = vrot.lane.b32.xlu0 %v1455_v8, %s1639_s27 }
  0xec   : > { %992 = vrot.lane.b32.xlu2 %v1637_v15, %s1638_s25 }
  0xee   : > { %590 = vrot.lane.b32.xlu1 %v1855_v38, %s1639_s27  ;;  %974 = vrot.lane.b32.xlu0 %v1835_v17, %s1634_s21 }
  0xf6   : > { %1013 = vrot.lane.b32.xlu1 %v1839_v20, %s1636_s13 }
  0xfe   : > { %953 = vrot.lane.b32.xlu1 %v1847_v27, %s1635_s17 }
 0x10a   : > { %v766_v9 = vpop.permute.xlu2 %765  ;;  %v718_v11 = vpop.permute.xlu1 %717 }
 0x116   : > { %v689_v10 = vpop.permute.xlu2 %688 }
 0x126   : > { %v1422_v13 = vpop.permute.xlu2 %1421 }
 0x127   : > { %v1424_v20 = vunpack.i.h.bf16 %v1422_v13  ;;  %v1423_v26 = vunpack.i.l.bf16 %v1422_v13 }
 0x129   : > { %v739_v34 = vsel %vm737_vm8, %v1424_v20, %v736_v12  ;;  %v738_v36 = vsel %vm737_vm8, %v1423_v26, %v1424_v20 }
 0x12e   : > { %v1447_v40 = vpop.permute.xlu2 %1446 }
 0x12f   : > { %v1449_v57 = vunpack.i.h.bf16 %v1447_v40  ;;  %v1448_v59 = vunpack.i.l.bf16 %v1447_v40 }
 0x131   : > { %v657_v1 = vsel %vm656_vm4, %v1448_v59, %v1449_v57 }
 0x140   : > { %v1427_v14 = vpop.permute.xlu1 %1426  ;;  %v1432_v16 = vpop.permute.xlu0 %1431 }
 0x141   : > { %v1429_v18 = vunpack.i.h.bf16 %v1427_v14  ;;  %v1428_v19 = vunpack.i.l.bf16 %v1427_v14  ;;  %v1434_v23 = vunpack.i.h.bf16 %v1432_v16  ;;  %v1433_v24 = vunpack.i.l.bf16 %v1432_v16 }
 0x143   : > { %v767_v25 = vsel %vm556_vm6, %v1428_v19, %v1429_v18  ;;  %v768_v17 = vsel %vm556_vm6, %v1429_v18, %v766_v9  ;;  %v719_v31 = vsel %vm608_vm5, %v1433_v24, %v1434_v23  ;;  %v720_v32 = vsel %vm608_vm5, %v1434_v23, %v718_v11  ;;  %v801_v24 = vld [vmem:[%s2112_s3] sm:$0xf] }
 0x144   : > { %v799_v28 = vpack.c.bf16 %v767_v25, %v767_v25  ;;  %v800_v27 = vpack.c.bf16 %v768_v17, %v768_v17  ;;  %v797_v47 = vpack.c.bf16 %v738_v36, %v719_v31  ;;  %v798_v48 = vpack.c.bf16 %v739_v34, %v720_v32  ;;  %v572_v25 = vpop.permute.xlu2 %571 }
 0x146   : > { %v814_v29 = vsel %vm812_vm7, %v799_v28, 0  ;;  %v817_v30 = vsel %vm812_vm7, %v800_v27, 0 }
 0x147   : > { %822 = vmatpush.bf16.msra.mxu2 %v814_v29  ;;  %835 = vmatpush.bf16.msra.mxu3 %v817_v30 }
 0x148   : > { %v1437_v35 = vpop.permute.xlu1 %1436  ;;  %v1442_v43 = vpop.permute.xlu0 %1441 }
 0x149   : > { %v1439_v44 = vunpack.i.h.bf16 %v1437_v35  ;;  %v1438_v45 = vunpack.i.l.bf16 %v1437_v35  ;;  %v1444_v49 = vunpack.i.h.bf16 %v1442_v43  ;;  %v1443_v52 = vunpack.i.l.bf16 %v1442_v43 }
 0x14b   : > { %823 = vmatpush.bf16.msra.mxu2 %v797_v47  ;;  %836 = vmatpush.bf16.msra.mxu3 %v798_v48  ;;  %v690_v55 = vsel %vm639_vm3, %v1438_v45, %v1439_v44  ;;  %v691_v56 = vsel %vm639_vm3, %v1439_v44, %v689_v10  ;;  %v626_v62 = vsel %vm625_vm2, %v1443_v52, %v1444_v49 }
 0x14c   : > { %v795_v60 = vpack.c.bf16 %v690_v55, %v1853_v37  ;;  %v796_v61 = vpack.c.bf16 %v691_v56, %v1855_v38  ;;  %v793_v7 = vpack.c.bf16 %v657_v1, %v626_v62  ;;  %v806_v27 = vpop.permute.xlu2 %805 }
 0x14f   : > { %824 = vmatpush.bf16.msra.mxu2 %v795_v60  ;;  %837 = vmatpush.bf16.msra.mxu3 %v796_v61 }
 0x150   : > { %v624_v0 = vpop.permute.xlu1 %623  ;;  %v655_v3 = vpop.permute.xlu0 %654 }
 0x151   : > { %v627_v6 = vsel %vm625_vm2, %v1444_v49, %v624_v0  ;;  %v658_v8 = vsel %vm656_vm4, %v1449_v57, %v655_v3 }
 0x152   : > { %v794_v9 = vpack.c.bf16 %v658_v8, %v627_v6 }
 0x153   : > { %825 = vmatpush.bf16.msra.mxu2 %v793_v7 }
 0x154   : > { %838 = vmatpush.bf16.msra.mxu3 %v794_v9 }
 0x158   : > { %v1452_v10 = vpop.permute.xlu1 %1451  ;;  %v1457_v11 = vpop.permute.xlu0 %1456 }
 0x159   : > { %v1454_v12 = vunpack.i.h.bf16 %v1452_v10  ;;  %v1453_v13 = vunpack.i.l.bf16 %v1452_v10  ;;  %v1459_v14 = vunpack.i.h.bf16 %v1457_v11  ;;  %v1458_v16 = vunpack.i.l.bf16 %v1457_v11 }
 0x15b   : > { %v574_v18 = vsel %vm573_vm1, %v1453_v13, %v1454_v12  ;;  %v592_v19 = vsel %vm480_vm0, %v1458_v16, %v1459_v14  ;;  %v575_v26 = vsel %vm573_vm1, %v1454_v12, %v572_v25 }
 0x15c   : > { %v791_v23 = vpack.c.bf16 %v592_v19, %v574_v18 }
 0x15e   : > { %826 = vmatpush.bf16.msra.mxu2 %v791_v23 }
 0x160   : > { %v591_v17 = vpop.permute.xlu1 %590  ;;  %v975_v3 = vpop.permute.xlu0 %974 }
 0x161   : > { %v593_v20 = vsel %vm480_vm0, %v1459_v14, %v591_v17  ;;  %1339 = vmatmul.msk.bf16.vlgmr.msra.gmra.mxu2 %vm808_vm9, %v801_v24 }
 0x162   : > { %v792_v28 = vpack.c.bf16 %v593_v20, %v575_v26 }
 0x164   : > { %839 = vmatpush.bf16.msra.mxu3 %v792_v28 }
 0x167   : > { %1340 = vmatmul.msk.bf16.vlgmr.msra.gmra.mxu3 %vm808_vm9, %v801_v24 }
 0x1e4   : > { %v828_v29 = vpop.f32.mrf.mxu2 }
 0x1e5   : > { %v829_v30 = vadd.f32 %v828_v29, %v806_v27 }
 0x1e7   : > { %v845_v31 = vmul.f32 0.5, %v829_v30  ;;  %v1050_v30 = vld [vmem:[%s2119_s10] sm:$0xff] }
 0x1e9   : > { %1506 = vtanh.f32 %v845_v31 }
 0x1ea   : > { %v841_v32 = vpop.f32.mrf.mxu3 }
 0x1eb   : > { %v842_v34 = vadd.f32 %v841_v32, %v806_v27 }
 0x1ec   : > { %v830_v36 = vpop.f32.mrf.mxu2 }
 0x1ed   : > { %v846_v35 = vmul.f32 0.5, %v842_v34 }
 0x1ef   : > { %1508 = vtanh.f32 %v846_v35  ;;  %v1507_v40 = vpop.eup %1506 }
 0x1f0   : > { %v849_v43 = vadd.f32 1.0, %v1507_v40 }
 0x1f2   : > { %v843_v44 = vpop.f32.mrf.mxu3  ;;  %v1973_v47 = vmul.f32 %v849_v43, %v845_v31 }
 0x1f4   : > { %v1003_v52 = vmul.f32 %v1973_v47, %v1843_v21  ;;  %v964_v57 = vmul.f32 %v1973_v47, %v1845_v22  ;;  %v919_v21 = vmul.f32 %v1973_v47, %v1875_v46  ;;  %v898_v22 = vmul.f32 %v1973_v47, %v1890_v53 }
 0x1f5   : > { %v1509_v45 = vpop.eup %1508  ;;  %v859_v53 = vmul.f32 %v1973_v47, %v1922_v4  ;;  %v993_v4 = vpop.permute.xlu2 %992 }
 0x1f6   : > { %v850_v48 = vadd.f32 1.0, %v1509_v45  ;;  %v1486_v62 = vpack.i.bf16 %v919_v21, %v1892_v54  ;;  %v1481_v1 = vpack.i.bf16 %v898_v22, %v1902_v58  ;;  %v1496_v54 = vpack.i.bf16 %v1973_v47, %v1637_v15  ;;  %v1104_v15 = vld [vmem:[%s2120_s11] sm:$0xff] }
 0x1f7   : > { %v1491_v58 = vpack.i.bf16 %v859_v53, %v1926_v5 }
 0x1f8   : > { %v1975_v49 = vmul.f32 %v850_v48, %v846_v35 }
 0x1fa   : > { %v1461_v55 = vpack.i.bf16 %v1975_v49, %v1973_v47  ;;  %v1004_v56 = vmul.f32 %v1975_v49, %v1863_v41  ;;  %v965_v59 = vmul.f32 %v1975_v49, %v1867_v42  ;;  %v944_v41 = vmul.f32 %v1975_v49, %v1884_v50 }
 0x1fb   : > { %v943_v42 = vmul.f32 %v1973_v47, %v1851_v33  ;;  %v860_v46 = vmul.f32 %v1975_v49, %v1910_v63  ;;  %v899_v50 = vmul.f32 %v1975_v49, %v1886_v51  ;;  %v920_v33 = vmul.f32 %v1975_v49, %v1857_v39  ;;  %v528_v39 = vld [vmem:[%s2117_s8] sm:$0xff]  ;;  %v1167_v51 = vld [vmem:[%s2121_s12 + $0x8] sm:$0xff]  ;;  %v1014_v63 = vpop.permute.xlu1 %1013 }
 0x1fc   : > { %1462 = vrot.lane.b32.xlu1 %v1461_v55, %s1638_s25  ;;  %v1466_v60 = vpack.i.bf16 %v1004_v56, %v1003_v52  ;;  %v1471_v61 = vpack.i.bf16 %v965_v59, %v964_v57  ;;  %v1166_v59 = vld [vmem:[%s2121_s12] sm:$0xff] }
 0x1fd   : > { %v1476_v0 = vpack.i.bf16 %v944_v41, %v943_v42 }
 0x1fe   : > { %1467 = vrot.lane.b32.xlu0 %v1466_v60, %s1636_s13  ;;  %1472 = vrot.lane.b32.xlu2 %v1471_v61, %s1634_s21  ;;  %s1359_s13 = sshll.u32 %s1732_s29, 5 }
 0x1ff   : > { %s1246_s23 = scalar_lea.hbm %s2145_s14, %s1359_s13  ;;  %s1580_s13 = scalar_lea.hbm %s2145_s14, 64 }
 0x203   : > { %v954_v5 = vpop.permute.xlu1 %953 }
 0x204   : > { %1487 = vrot.lane.b32.xlu1 %v1486_v62, %s1633_s16 }
 0x206   : > { %1477 = vrot.lane.b32.xlu0 %v1476_v0, %s1635_s17  ;;  %1482 = vrot.lane.b32.xlu2 %v1481_v1, %s1632_s22  ;;  %s460_s17 = scalar_lea.vmem [#allocation8], %s1330_s20  ;;  %s1249_s20 = sshll.u32 %s1246_s23, 4  ;;  %s1250_s20 = int_to_ptr.hbm [resolvable:$true] %s1249_s20 }
 0x207   : > { %s1247_s18 = sshll.u32 %s460_s17, 4  ;;  %s1574_s29 = sshra.s32 %s1250_s20, 4  ;;  %s1248_s18 = int_to_ptr.vmem [resolvable:$true] %s1247_s18  ;;  %s1575_s29 = int_to_ptr.hbm [resolvable:$true] %s1574_s29 }
 0x208   : > { %s1576_s21 = scalar_lea.hbm %s1575_s29, 32  ;;  %p1581_p0 = scmp.lt.s32.totalorder %s1575_s29, %s2145_s14 }
 0x209   : > { %p1577_p6 = scmp.ne.s32.totalorder %s1575_s29, %s1576_s21  ;;  %p1582_p1 = scmp.lt.s32.totalorder %s1580_s13, %s1576_s21 }
 0x20b   : > { %p1578_p9 = pnand %p1577_p6, %p1761_p11  ;;  %p1583_p3 = por %p1582_p1, %p1581_p0 }
 0x20c   : > { %868 = vrot.lane.b32.xlu1 %v860_v46, %s1631_s15 }
 0x20d   : > { %p1579_p13 = pneg %p1578_p9 }
 0x20e   : > { %907 = vrot.lane.b32.xlu0 %v899_v50, %s1632_s22  ;;  %928 = vrot.lane.b32.xlu2 %v920_v33, %s1633_s16 }
 0x20f   : > { %p1584_p4 = pnand %p1583_p3, %p1579_p13 }
 0x214   : > { %1053 = vperm.xlu1 %1501, %v1050_v30  }
 0x216   : > { %1497 = vrot.lane.b32.xlu2 %v1496_v54, %s1639_s27  ;;  %1492 = vrot.lane.b32.xlu0 %v1491_v58, %s1631_s15  ;;  %v1049_v54 = vld [vmem:[%s2113_s4] sm:$0xf] }
 0x21c   : > { %1170 = vperm.xlu1 %1501, %v1166_v59  }
 0x21e   : > { %531 = vperm.xlu2 %1460, %v528_v39   ;;  %886 = vrot.lane.b32.xlu0 %v1975_v49, %s1639_s27 }
 0x226   : > { %1175 = vperm.xlu2 %1460, %v1167_v51   ;;  %1107 = vperm.xlu0 %1419, %v1104_v15  }
 0x258   : > { %v1473_v2 = vpop.permute.xlu2 %1472 }
 0x259   : > { %v1475_v16 = vunpack.i.h.bf16 %v1473_v2  ;;  %v1474_v18 = vunpack.i.l.bf16 %v1473_v2 }
 0x25b   : > { %v976_v27 = vsel %vm608_vm5, %v1474_v18, %v1475_v16  ;;  %v977_v29 = vsel %vm608_vm5, %v1475_v16, %v975_v3 }
 0x260   : > { %v1483_v7 = vpop.permute.xlu2 %1482 }
 0x261   : > { %v1485_v48 = vunpack.i.h.bf16 %v1483_v7  ;;  %v1484_v52 = vunpack.i.l.bf16 %v1483_v7 }
 0x263   : > { %v909_v61 = vsel %vm625_vm2, %v1484_v52, %v1485_v48 }
 0x268   : > { %v929_v36 = vpop.permute.xlu2 %928 }
 0x26e   : > { %v1463_v6 = vpop.permute.xlu1 %1462 }
 0x26f   : > { %v1465_v11 = vunpack.i.h.bf16 %v1463_v6  ;;  %v1464_v12 = vunpack.i.l.bf16 %v1463_v6 }
 0x270   : > { %v1468_v8 = vpop.permute.xlu0 %1467 }
 0x271   : > { %v1470_v9 = vunpack.i.h.bf16 %v1468_v8  ;;  %v1469_v10 = vunpack.i.l.bf16 %v1468_v8  ;;  %v994_v17 = vsel %vm737_vm8, %v1464_v12, %v1465_v11  ;;  %v995_v20 = vsel %vm737_vm8, %v1465_v11, %v993_v4  ;;  %v495_v4 = vpop.f32.mrf.mxu0 }
 0x272   : > { %v1045_v34 = vpack.c.bf16 %v994_v17, %v976_v27  ;;  %v1046_v35 = vpack.c.bf16 %v995_v20, %v977_v29  ;;  %v1103_v20 = vld [vmem:[%s2114_s5] sm:$0xf] }
 0x273   : > { %v1015_v13 = vsel %vm556_vm6, %v1469_v10, %v1470_v9  ;;  %v1016_v14 = vsel %vm556_vm6, %v1470_v9, %v1014_v63 }
 0x274   : > { %v1047_v19 = vpack.c.bf16 %v1015_v13, %v1015_v13  ;;  %v1048_v23 = vpack.c.bf16 %v1016_v14, %v1016_v14 }
 0x276   : > { %v1060_v24 = vsel %vm812_vm7, %v1047_v19, 0  ;;  %v1063_v25 = vsel %vm812_vm7, %v1048_v23, 0  ;;  %v1488_v26 = vpop.permute.xlu1 %1487 }
 0x277   : > { %1068 = vmatpush.bf16.msrb.mxu0 %v1060_v24  ;;  %1081 = vmatpush.bf16.msrb.mxu1 %v1063_v25  ;;  %v1490_v40 = vunpack.i.h.bf16 %v1488_v26  ;;  %v1489_v43 = vunpack.i.l.bf16 %v1488_v26 }
 0x278   : > { %v1478_v28 = vpop.permute.xlu0 %1477 }
 0x279   : > { %v1480_v31 = vunpack.i.h.bf16 %v1478_v28  ;;  %v1479_v32 = vunpack.i.l.bf16 %v1478_v28  ;;  %v930_v57 = vsel %vm656_vm4, %v1489_v43, %v1490_v40  ;;  %v931_v22 = vsel %vm656_vm4, %v1490_v40, %v929_v36 }
 0x27a   : > { %v1041_v41 = vpack.c.bf16 %v930_v57, %v909_v61 }
 0x27b   : > { %1069 = vmatpush.bf16.msrb.mxu0 %v1045_v34  ;;  %1082 = vmatpush.bf16.msrb.mxu1 %v1046_v35  ;;  %v955_v44 = vsel %vm639_vm3, %v1479_v32, %v1480_v31  ;;  %v956_v45 = vsel %vm639_vm3, %v1480_v31, %v954_v5  ;;  %v509_v5 = vpop.f32.mrf.mxu1 }
 0x27c   : > { %v1043_v55 = vpack.c.bf16 %v955_v44, %v1973_v47  ;;  %v1044_v56 = vpack.c.bf16 %v956_v45, %v1975_v49  ;;  %v1498_v49 = vpop.permute.xlu2 %1497 }
 0x27d   : > { %v1500_v62 = vunpack.i.h.bf16 %v1498_v49  ;;  %v1499_v42 = vunpack.i.l.bf16 %v1498_v49 }
 0x27e   : > { %v869_v58 = vpop.permute.xlu1 %868 }
 0x27f   : > { %1070 = vmatpush.bf16.msrb.mxu0 %v1043_v55  ;;  %1083 = vmatpush.bf16.msrb.mxu1 %v1044_v56  ;;  %v888_v33 = vsel %vm480_vm0, %v1499_v42, %v1500_v62 }
 0x280   : > { %v908_v60 = vpop.permute.xlu0 %907 }
 0x281   : > { %v910_v21 = vsel %vm625_vm2, %v1485_v48, %v908_v60 }
 0x282   : > { %v1042_v47 = vpack.c.bf16 %v931_v22, %v910_v21 }
 0x283   : > { %1071 = vmatpush.bf16.msrb.mxu0 %v1041_v41 }
 0x284   : > { %1084 = vmatpush.bf16.msrb.mxu1 %v1042_v47  ;;  %v1358_v47 = vld [vmem:[%s2115_s6] sm:$0xff] }
 0x286   : > { %v1054_v2 = vpop.permute.xlu1 %1053 }
 0x288   : > { %v1493_v0 = vpop.permute.xlu0 %1492 }
 0x289   : > { %v1495_v1 = vunpack.i.h.bf16 %v1493_v0  ;;  %v1494_v46 = vunpack.i.l.bf16 %v1493_v0 }
 0x28b   : > { %v870_v50 = vsel %vm573_vm1, %v1494_v46, %v1495_v1  ;;  %v871_v15 = vsel %vm573_vm1, %v1495_v1, %v869_v58 }
 0x28c   : > { %v1039_v53 = vpack.c.bf16 %v888_v33, %v870_v50 }
 0x28e   : > { %1072 = vmatpush.bf16.msrb.mxu0 %v1039_v53  ;;  %v1171_v1 = vpop.permute.xlu1 %1170 }
 0x290   : > { %v887_v39 = vpop.permute.xlu0 %886 }
 0x291   : > { %v889_v51 = vsel %vm480_vm0, %v1500_v62, %v887_v39  ;;  %1341 = vmatmul.msk.bf16.vlgmr.msrb.gmra.mxu0 %vm808_vm9, %v1049_v54 }
 0x292   : > { %v1040_v63 = vpack.c.bf16 %v889_v51, %v871_v15 }
 0x294   : > { %1085 = vmatpush.bf16.msrb.mxu1 %v1040_v63 }
 0x297   : > { %1342 = vmatmul.msk.bf16.vlgmr.msrb.gmra.mxu1 %vm808_vm9, %v1049_v54 }
 0x298   : > { %v1108_v32 = vpop.permute.xlu0 %1107 }
 0x30e   : > { %v1074_v3 = vpop.f32.mrf.mxu0 }
 0x30f   : > { %v1075_v6 = vadd.f32 %v1074_v3, %v1054_v2 }
 0x311   : > { %v1091_v7 = vmul.f32 0.5, %v1075_v6 }
 0x313   : > { %1510 = vtanh.f32 %v1091_v7 }
 0x314   : > { %v1087_v8 = vpop.f32.mrf.mxu1 }
 0x315   : > { %v1088_v9 = vadd.f32 %v1087_v8, %v1054_v2 }
 0x316   : > { %v1076_v10 = vpop.f32.mrf.mxu0 }
 0x317   : > { %v1092_v11 = vmul.f32 0.5, %v1088_v9 }
 0x319   : > { %v1511_v12 = vpop.eup %1510  ;;  %1512 = vtanh.f32 %v1092_v11 }
 0x31a   : > { %v1095_v13 = vadd.f32 1.0, %v1511_v12 }
 0x31c   : > { %v1097_v14 = vmul.f32 %v1095_v13, %v1091_v7  ;;  %v1089_v16 = vpop.f32.mrf.mxu1 }
 0x31e   : > { %v1099_v18 = vadd.f32 %v1097_v14, %v1853_v37  ;;  %v532_v37 = vpop.permute.xlu2 %531 }
 0x31f   : > { %v1513_v19 = vpop.eup %1512  ;;  %v534_v29 = vadd.f32 %v532_v37, %v495_v4  ;;  %v535_v31 = vadd.f32 %v532_v37, %v509_v5 }
 0x320   : > { %v1096_v23 = vadd.f32 1.0, %v1513_v19  ;;  %v1101_v24 = vpack.c.bf16 %v1099_v18, %v1099_v18 }
 0x321   : > { %v536_v30 = vmul.f32 0.5, %v534_v29  ;;  %v537_v36 = vmul.f32 0.5, %v535_v31 }
 0x322   : > { %v1098_v25 = vmul.f32 %v1096_v23, %v1092_v11  ;;  %v1115_v17 = vsel %vm812_vm7, %v1101_v24, 0 }
 0x323   : > { %1127 = vmatpush.bf16.msrb.mxu2 %v1115_v17  ;;  %1514 = vtanh.f32 %v536_v30 }
 0x324   : > { %v1100_v26 = vadd.f32 %v1098_v25, %v1855_v38 }
 0x326   : > { %1343 = vmatmul.msk.bf16.vlgmr.msrb.gmra.mxu2 %vm1110_vm10, %v1103_v20  ;;  %v1102_v28 = vpack.c.bf16 %v1100_v26, %v1100_v26  ;;  %v1176_v58 = vpop.permute.xlu2 %1175 }
 0x328   : > { %v1118_v27 = vsel %vm812_vm7, %v1102_v28, 0 }
 0x329   : > { %1140 = vmatpush.bf16.msrb.mxu3 %v1118_v27  ;;  %v1515_v44 = vpop.eup %1514 }
 0x32a   : > { %v540_v52 = vadd.f32 1.0, %v1515_v44 }
 0x32c   : > { %1344 = vmatmul.msk.bf16.vlgmr.msrb.gmra.mxu3 %vm1110_vm10, %v1103_v20  ;;  %v542_v59 = vmul.f32 %v540_v52, %v536_v30 }
 0x3a9   : > { %v1129_v34 = vpop.f32.mrf.mxu2 }
 0x3aa   : > { %v1130_v35 = vadd.f32 %v1129_v34, %v1108_v32 }
 0x3ac   : > { %v1146_v40 = vmul.f32 0.5, %v1130_v35 }
 0x3ae   : > { %1516 = vtanh.f32 %v1146_v40 }
 0x3af   : > { %v1142_v43 = vpop.f32.mrf.mxu3  ;;  %1518 = vtanh.f32 %v537_v36 }
 0x3b0   : > { %v1143_v38 = vadd.f32 %v1142_v43, %v1108_v32 }
 0x3b1   : > { %v1131_v45 = vpop.f32.mrf.mxu2 }
 0x3b2   : > { %v1147_v48 = vmul.f32 0.5, %v1143_v38 }
 0x3b4   : > { %v1517_v55 = vpop.eup %1516  ;;  %1520 = vtanh.f32 %v1147_v48 }
 0x3b5   : > { %v1150_v56 = vadd.f32 1.0, %v1517_v55  ;;  %v1519_v57 = vpop.eup %1518 }
 0x3b6   : > { %v541_v21 = vadd.f32 1.0, %v1519_v57 }
 0x3b7   : > { %v1152_v60 = vmul.f32 %v1150_v56, %v1146_v40  ;;  %v1144_v61 = vpop.f32.mrf.mxu3 }
 0x3b8   : > { %v543_v62 = vmul.f32 %v541_v21, %v537_v36 }
 0x3b9   : > { %v1162_v41 = vpack.c.bf16 %v542_v59, %v1152_v60 }
 0x3ba   : > { %v1521_v22 = vpop.eup %1520 }
 0x3bb   : > { %v1151_v49 = vadd.f32 1.0, %v1521_v22  ;;  %1193 = vmatpush.bf16.msra.mxu0 %v1162_v41 }
 0x3bd   : > { %v1153_v42 = vmul.f32 %v1151_v49, %v1147_v48 }
 0x3be   : > { %1349 = vmatmul.msk.bf16.vlgmr.msra.gmra.mxu0 %vm480_vm0, %v1358_v47 }
 0x3bf   : > { %v1163_v0 = vpack.c.bf16 %v543_v62, %v1153_v42 }
 0x3c1   : > { %1207 = vmatpush.bf16.msra.mxu1 %v1163_v0 }
 0x3c4   : > { %1350 = vmatmul.msk.bf16.vlgmr.msra.gmra.mxu1 %vm480_vm0, %v1358_v47 }
 0x43b   : > { %v1195_v46 = vpop.f32.mrf.mxu0 }
 0x43c   : > { %v1196_v50 = vadd.f32 %v1195_v46, %v1171_v1 }
 0x43e   : > { %v1214_v33 = vmul.f32 0.5, %v1196_v50 }
 0x440   : > { %1522 = vtanh.f32 %v1214_v33 }
 0x441   : > { %v1209_v53 = vpop.f32.mrf.mxu1 }
 0x442   : > { %v1210_v54 = vadd.f32 %v1209_v53, %v1171_v1 }
 0x443   : > { %v1197_v39 = vpop.f32.mrf.mxu0 }
 0x444   : > { %v1215_v51 = vmul.f32 0.5, %v1210_v54  ;;  %v1198_v15 = vadd.f32 %v1197_v39, %v1176_v58 }
 0x446   : > { %v1523_v63 = vpop.eup %1522  ;;  %1524 = vtanh.f32 %v1215_v51  ;;  %v1216_v4 = vmul.f32 0.5, %v1198_v15 }
 0x447   : > { %v1222_v5 = vadd.f32 1.0, %v1523_v63 }
 0x448   : > { %1526 = vtanh.f32 %v1216_v4 }
 0x449   : > { %v1226_v2 = vmul.f32 %v1222_v5, %v1214_v33  ;;  %v1211_v3 = vpop.f32.mrf.mxu1 }
 0x44a   : > { %v1212_v6 = vadd.f32 %v1211_v3, %v1176_v58 }
 0x44b   : > { %1230 = vst [vmem:[%s460_s17] sm:$0xff] %v1226_v2 }
 0x44c   : > { %v1525_v7 = vpop.eup %1524  ;;  %v1217_v8 = vmul.f32 0.5, %v1212_v6 }
 0x44d   : > { %v1223_v9 = vadd.f32 1.0, %v1525_v7 }
 0x44e   : > { %v1527_v10 = vpop.eup %1526  ;;  %1528 = vtanh.f32 %v1217_v8 }
 0x44f   : > { %v1227_v11 = vmul.f32 %v1223_v9, %v1215_v51  ;;  %v1224_v12 = vadd.f32 1.0, %v1527_v10 }
 0x451   : > { %1231 = vst [vmem:[%s460_s17 + $0x8] sm:$0xff] %v1227_v11  ;;  %v1228_v13 = vmul.f32 %v1224_v12, %v1216_v4 }
 0x453   : > { %1232 = vst [vmem:[%s460_s17 + $0x10] sm:$0xff] %v1228_v13 }
 0x454   : > { %v1529_v14 = vpop.eup %1528 }
 0x455   : > { %v1225_v16 = vadd.f32 1.0, %v1529_v14 }
 0x457   : > { %v1229_v18 = vmul.f32 %v1225_v16, %v1217_v8 }
 0x459   : > { %1233 = vst [vmem:[%s460_s17 + $0x18] sm:$0xff] %v1229_v18 }
 0x45a   : > { %1587 = shalt.err (!%p1584_p4)
}
 0x45b   : > { %s1640_s30 = smov 256  }
 0x45c   : > { %1362 = dma.vmem_to_hbm [thread:$0]  (%p1761_p11), %s1248_s18, 512, %s1250_s20, %s1235_s24, %s1640_s30, %s1640_s30, %s1639_s27  }
 0x45d PF: > { %s2147_s17 = sld [smem:[#allocation11_spill]]  ;;  %p2149_p7 = scmp.ge.s32.totalorder %s1626_s28, 2 }
 0x45f   : > { %p1369_p5 = pnand %p2149_p7, %p1765_p12 }
 0x461   : > { %p1370_p8 = pneg %p1369_p5 }
 0x463   : > { %s1264_s0 = sand.u32 1, %s2147_s17  }
 0x464   : > { %s1265_s22 = scalar_lea.sflag [#allocation7], %s1264_s0 }
 0x465   : > { %1609 = dma.done.wait (%p1370_p8), %s1265_s22, 512  }
 0x466   : > { %1611 = vsyncadd (%p1370_p8), %s1265_s22, 4294966784  ;;  %s2150_s28 = sld [smem:[#allocation13_spill]]  ;;  %s2153_s25 = smov %s1618_s26 }
 0x467   : > { %s2151_s29 = sld [smem:[#allocation12_spill]] }
 0x468   : > { %s2152_s27 = sld [smem:[#allocation14_spill]] }
 0x46c   : > { %p26_p10 = scmp.ge.s32.totalorder %s2150_s28, 4  }
 0x46d   : > { %s2154_s26 = smov %s2151_s29 }
 0x46e   :  { %28 = sbr.rel (!%p26_p10) target bundleno = 8 (0x8), region = 118 }
 0x473   :  { %1271 = vsyncpa [#allocation6], 1 }
 0x474   :  { %1273 = vsyncpa [#allocation6 + $0x1], 1 }
 0x475   :  { %1274 = vsyncpa [#allocation7], 1 }
 0x476   :  { %1276 = vsyncpa [#allocation7 + $0x1], 1 }

</bundles_post_ra>
